<compile_context>
chip_gen: v6e
topology: v6e:2x2x1
jax: 0.10.0
libtpu: 0.0.40
codegen_flags: <defaults>
</compile_context>

<pallas_src>
import jax
import jax.numpy as jnp
from jax import lax
from jax.experimental import pallas as pl
from jax.experimental.pallas import tpu as pltpu


# ----------------------------- Pallas kernel --------------------------------
def maskprop_kernel(x_ref, wb1_ref, b1_ref, wb2_ref, b2_ref,
                    w3_ref, b3_ref, w4_ref, b4_ref, o_ref, pad_ref):
    # x_ref  : (G, H, W*C) f32    lane-dense activation slabs (G images/step)
    # wb*_ref: (3, W*C, W*C) bf16 edge-clipped banded 3x3 weights (BN folded)
    # b*_ref : (1, W*C) f32       per-pixel-tiled folded biases
    # w3_ref : (W*C, W*C) bf16    block-diagonal 1x1 expand conv (BN folded)
    # w4_ref : (W*C, W) bf16      block-diagonal 1x1 final conv (8 -> 1)
    # b4_ref : (1,) f32 in SMEM   final scalar bias
    # o_ref  : (G, H, W) f32      output slabs
    # pad_ref: (H+2, W*C) f32     VMEM scratch with a 1-row y-halo (x halo is
    #                             folded into the banded weights)
    G, H, WC = x_ref.shape
    W = o_ref.shape[2]

    # Zero only the halo rows; the interior is fully overwritten before each
    # conv.  Done every grid step: with the "parallel" batch axis each core has
    # its own scratch, so a program_id==0 guard would be unsafe.
    zero_row = jnp.zeros((1, WC), jnp.float32)
    pad_ref[0:1, :] = zero_row
    pad_ref[H + 1:H + 2, :] = zero_row

    def conv3x3(wb_ref):
        # Sum over the 3 kernel rows; each term is one lane-dense
        # (H,128)@(128,128) bf16 MXU matmul with f32 accumulation (the dx
        # shifts + channel mixing + edge clipping live in the banded weight).
        acc = jnp.dot(pad_ref[0:H, :].astype(jnp.bfloat16), wb_ref[0],
                      preferred_element_type=jnp.float32)
        for dy in (1, 2):
            acc = acc + jnp.dot(pad_ref[dy:dy + H, :].astype(jnp.bfloat16),
                                wb_ref[dy],
                                preferred_element_type=jnp.float32)
        return acc                                   # (H, W*C) f32

    for g in range(G):                               # G is 1 (v7x) or N (v5e/v6e)
        x = x_ref[g]                                 # (H, W*C) f32

        # conv_block[0]: 3x3 conv + (folded) BN + ReLU
        pad_ref[1:H + 1, :] = x
        h1 = jnp.maximum(conv3x3(wb1_ref) + b1_ref[...], 0.0)

        # conv_block[1]: 3x3 conv + (folded) BN + ReLU
        pad_ref[1:H + 1, :] = h1
        h2 = jnp.maximum(conv3x3(wb2_ref) + b2_ref[...], 0.0)

        # residual add + ReLU:  relu(x + conv_block(x))   (all f32)
        r = jnp.maximum(x + h2, 0.0)

        # expand_block: 1x1 conv + (folded) BN + ReLU (block-diagonal matmul)
        e = jnp.maximum(
            jnp.dot(r.astype(jnp.bfloat16), w3_ref[...],
                    preferred_element_type=jnp.float32) + b3_ref[...], 0.0)

        # final 1x1 conv 8 -> 1 (block-diagonal (W*C, W) matmul), scalar bias
        out = (jnp.dot(e.astype(jnp.bfloat16), w4_ref[...],
                       preferred_element_type=jnp.float32) + b4_ref[0])
        o_ref[g] = out                               # (H, W)


# ------------------------------ wrapper --------------------------------------
def _images_per_grid_step(N):
    """v7x has 2 TensorCores/chip: keep one image per grid step so the
    'parallel' batch axis feeds both cores.  Single-TC v5e/v6e: fold the whole
    batch into one grid step (saves per-step overhead, kernel is overhead-bound)."""
    try:
        kind = jax.devices()[0].device_kind.lower()
    except Exception:
        return 1
    if ("v7" in kind) or ("7x" in kind):
        return 1
    return N


def maskprop_forward(x, params):
    """x: (N, H, W, C) float32 NHWC.  Returns (N, H, W, 1)."""
    N, H, W, C = x.shape
    WC = W * C
    wb1, b1, wb2, b2, w3, b3, w4, b4 = params

    G = _images_per_grid_step(N)
    assert N % G == 0

    x2 = x.reshape(N, H, WC)                         # lane-dense slab per image

    const3 = lambda n: (0, 0, 0)
    const2 = lambda n: (0, 0)

    # Weights are ~260 KB total in bf16 and use constant-index specs, so they
    # DMA once and stay VMEM-resident across the grid.  (pl.Buffered(1) on the
    # weight specs would drop the redundant second buffer, but VMEM is a
    # non-issue at this size so we keep the default for robustness.)
    out = pl.pallas_call(
        maskprop_kernel,
        out_shape=jax.ShapeDtypeStruct((N, H, W), jnp.float32),
        grid_spec=pltpu.PrefetchScalarGridSpec(
            num_scalar_prefetch=0,
            grid=(N // G,),
            in_specs=[
                pl.BlockSpec((G, H, WC), lambda n: (n, 0, 0)),   # x slabs
                pl.BlockSpec((3, WC, WC), const3),               # banded w1
                pl.BlockSpec((1, WC), const2),                   # tiled b1
                pl.BlockSpec((3, WC, WC), const3),               # banded w2
                pl.BlockSpec((1, WC), const2),                   # tiled b2
                pl.BlockSpec((WC, WC), const2),                  # blockdiag w3
                pl.BlockSpec((1, WC), const2),                   # tiled b3
                pl.BlockSpec((WC, W), const2),                   # blockdiag w4
                pl.BlockSpec(memory_space=pltpu.MemorySpace.SMEM),  # b4 scalar
            ],
            out_specs=pl.BlockSpec((G, H, W), lambda n: (n, 0, 0)),
            scratch_shapes=[pltpu.VMEM((H + 2, WC), jnp.float32)],
        ),
        compiler_params=pltpu.CompilerParams(
            dimension_semantics=("parallel",)),      # v7x: 2 images -> 2 TCs
    )(x2, wb1, b1, wb2, b2, w3, b3, w4, b4)

    return out.reshape(N, H, W, 1)


# ------------------------- parameters (deterministic) ------------------------
def init_params(key, C=8):
    keys = jax.random.split(key, 20)
    it = iter(keys)

    def conv_w(kh, kw, cin, cout, scale=0.2):
        return scale * jax.random.normal(next(it), (kh, kw, cin, cout),
                                         jnp.float32)

    def bias(cout, scale=0.1):
        return scale * jax.random.normal(next(it), (cout,), jnp.float32)

    def bn(cout):
        gamma = 1.0 + 0.1 * jax.random.normal(next(it), (cout,), jnp.float32)
        beta = 0.1 * jax.random.normal(next(it), (cout,), jnp.float32)
        mean = 0.1 * jax.random.normal(next(it), (cout,), jnp.float32)
        var = 1.0 + 0.1 * jax.random.uniform(next(it), (cout,), jnp.float32)
        return gamma, beta, mean, var

    raw = {
        'w1': conv_w(3, 3, C, C), 'b1': bias(C), 'bn1': bn(C),
        'w2': conv_w(3, 3, C, C), 'b2': bias(C), 'bn2': bn(C),
        'w3': conv_w(1, 1, C, C), 'b3': bias(C), 'bn3': bn(C),
        'w4': conv_w(1, 1, C, 1), 'b4': bias(1),
    }
    return raw


def prep_params(raw, W, C, eps=1e-5):
    """Fold BN into the convs (exact) and pre-shape weights for the kernel:
    edge-clipped banded (3, W*C, W*C) weights for the 3x3 convs (padding=1 in x
    is realized by the clipped shift masks) and block-diagonal weights for the
    1x1 convs, matching the (H, W*C) slab activation layout.  Weights -> bf16,
    biases stay f32 (added on the f32 accumulator)."""
    def fold(w, b, bn_params):
        gamma, beta, mean, var = bn_params
        s = gamma / jnp.sqrt(var + eps)
        return w * s, (b - mean) * s + beta

    w1f, b1f = fold(raw['w1'], raw['b1'], raw['bn1'])
    w2f, b2f = fold(raw['w2'], raw['b2'], raw['bn2'])
    w3f, b3f = fold(raw['w3'], raw['b3'], raw['bn3'])

    xin = jnp.arange(W)[:, None]
    xout = jnp.arange(W)[None, :]

    def band(w):   # w: (3, 3, C, Cout) HWIO -> (3, W*C, W*Cout), K = W*C = 128
        bands = []
        for ky in range(3):
            B = jnp.zeros((W * C, W * w.shape[3]), jnp.float32)
            for kx in range(3):
                # edge-clipped dx shift: xin = xout + kx - 1, OOB taps drop out
                S = (xin == xout + (kx - 1)).astype(jnp.float32)   # (W, W)
                B = B + jnp.kron(S, w[ky, kx])
            bands.append(B)
        return jnp.stack(bands)

    eye_w = jnp.eye(W, dtype=jnp.float32)
    wb1 = band(w1f).astype(jnp.bfloat16)
    wb2 = band(w2f).astype(jnp.bfloat16)
    w3_bd = jnp.kron(eye_w, w3f[0, 0]).astype(jnp.bfloat16)       # (W*C, W*C)
    w4_bd = jnp.kron(eye_w, raw['w4'][0, 0]).astype(jnp.bfloat16) # (W*C, W)

    return (wb1, jnp.tile(b1f, W).reshape(1, W * C),
            wb2, jnp.tile(b2f, W).reshape(1, W * C),
            w3_bd, jnp.tile(b3f, W).reshape(1, W * C),
            w4_bd, raw['b4'].reshape(1,))


# ------------------------ pure-JAX reference (NHWC) ---------------------------
def _conv(x, w, b, padding):
    y = lax.conv_general_dilated(
        x, w, window_strides=(1, 1), padding=padding,
        dimension_numbers=('NHWC', 'HWIO', 'NHWC'))
    return y + b


def _bn_eval(x, gamma, beta, mean, var, eps=1e-5):
    return (x - mean) / jnp.sqrt(var + eps) * gamma + beta


def ref_forward(x, raw):
    h = jax.nn.relu(_bn_eval(_conv(x, raw['w1'], raw['b1'], 'SAME'), *raw['bn1']))
    h = jax.nn.relu(_bn_eval(_conv(h, raw['w2'], raw['b2'], 'SAME'), *raw['bn2']))
    r = jax.nn.relu(x + h)
    e = jax.nn.relu(_bn_eval(_conv(r, raw['w3'], raw['b3'], 'SAME'), *raw['bn3']))
    return _conv(e, raw['w4'], raw['b4'], 'SAME')


# --------------------------------- main ---------------------------------------
if __name__ == "__main__":
    key = jax.random.PRNGKey(0)
    kx, kp = jax.random.split(key)

    N, H, W, C = 2, 16, 16, 8          # PyTorch NCHW equivalent: (2, 8, 16, 16)
    x = jax.random.normal(kx, (N, H, W, C), jnp.float32)

    raw = init_params(kp, C)
    params = prep_params(raw, W, C)

    out = maskprop_forward(x, params)
    out = jax.block_until_ready(out)

    ref = ref_forward(x, raw)
    assert out.shape == (N, H, W, 1), out.shape
    max_err = float(jnp.max(jnp.abs(out - ref)))
    # Tolerance sized for bf16 MXU operands with f32 accumulation.
    if not bool(jnp.allclose(out, ref, atol=5e-2, rtol=5e-2)):
        raise AssertionError(f"kernel vs reference mismatch, max abs err={max_err}")

    print("KERNEL_OK")
</pallas_src>

<mosaic_0001>
module attributes {stable_mosaic.version = 11 : i64} {
  func.func @maskprop_kernel(%arg0: i32, %arg1: memref<2x16x128xf32, #tpu.memory_space<vmem>>, %arg2: memref<3x128x128xbf16, #tpu.memory_space<vmem>>, %arg3: memref<1x128xf32, #tpu.memory_space<vmem>>, %arg4: memref<3x128x128xbf16, #tpu.memory_space<vmem>>, %arg5: memref<1x128xf32, #tpu.memory_space<vmem>>, %arg6: memref<128x128xbf16, #tpu.memory_space<vmem>>, %arg7: memref<1x128xf32, #tpu.memory_space<vmem>>, %arg8: memref<128x16xbf16, #tpu.memory_space<vmem>>, %arg9: memref<1xf32, #tpu.memory_space<smem>>, %arg10: memref<2x16x16xf32, #tpu.memory_space<vmem>>, %arg11: memref<18x128xf32, #tpu.memory_space<vmem>>) attributes {dimension_semantics = [#tpu.dimension_semantics<parallel>], iteration_bounds = array<i64: 1>, scalar_prefetch = 0 : i64, scratch_operands = 1 : i64, tpu.core_type = #tpu.core_type<tc>, window_params = [{transform_indices = @transform_0, window_bounds = array<i64: 2, 16, 128>}, {pipeline_mode = #tpu.pipeline_mode<synchronous>, transform_indices = @transform_1, window_bounds = array<i64: 3, 128, 128>}, {pipeline_mode = #tpu.pipeline_mode<synchronous>, transform_indices = @transform_2, window_bounds = array<i64: 1, 128>}, {pipeline_mode = #tpu.pipeline_mode<synchronous>, transform_indices = @transform_3, window_bounds = array<i64: 3, 128, 128>}, {pipeline_mode = #tpu.pipeline_mode<synchronous>, transform_indices = @transform_4, window_bounds = array<i64: 1, 128>}, {pipeline_mode = #tpu.pipeline_mode<synchronous>, transform_indices = @transform_5, window_bounds = array<i64: 128, 128>}, {pipeline_mode = #tpu.pipeline_mode<synchronous>, transform_indices = @transform_6, window_bounds = array<i64: 1, 128>}, {pipeline_mode = #tpu.pipeline_mode<synchronous>, transform_indices = @transform_7, window_bounds = array<i64: 128, 16>}, {transform_indices = @transform_8, window_bounds = array<i64: 1>}, {transform_indices = @transform_9, window_bounds = array<i64: 2, 16, 16>}]} {
    %cst = arith.constant 0.000000e+00 : f32
    %0 = vector.broadcast %cst : f32 to vector<1x128xf32>
    %c0 = arith.constant 0 : index
    %c0_0 = arith.constant 0 : index
    %1 = vector.load %arg11[%c0, %c0_0] : memref<18x128xf32, #tpu.memory_space<vmem>>, vector<1x128xf32>
    tpu.vector_store %arg11[%c0, %c0_0], %0 {strides = array<i32>} : memref<18x128xf32, #tpu.memory_space<vmem>>, vector<1x128xf32>,
    %c17 = arith.constant 17 : index
    %c0_1 = arith.constant 0 : index
    %2 = vector.load %arg11[%c17, %c0_1] : memref<18x128xf32, #tpu.memory_space<vmem>>, vector<1x128xf32>
    tpu.vector_store %arg11[%c17, %c0_1], %0 {strides = array<i32>} : memref<18x128xf32, #tpu.memory_space<vmem>>, vector<1x128xf32>,
    %c0_2 = arith.constant 0 : index
    %c0_3 = arith.constant 0 : index
    %c0_4 = arith.constant 0 : index
    %3 = vector.load %arg1[%c0_2, %c0_3, %c0_4] : memref<2x16x128xf32, #tpu.memory_space<vmem>>, vector<1x16x128xf32>
    %4 = vector.shape_cast %3 : vector<1x16x128xf32> to vector<16x128xf32>
    %c1 = arith.constant 1 : index
    %c0_5 = arith.constant 0 : index
    %5 = vector.load %arg11[%c1, %c0_5] : memref<18x128xf32, #tpu.memory_space<vmem>>, vector<16x128xf32>
    tpu.vector_store %arg11[%c1, %c0_5], %4 {strides = array<i32>} : memref<18x128xf32, #tpu.memory_space<vmem>>, vector<16x128xf32>,
    %c0_6 = arith.constant 0 : index
    %c0_7 = arith.constant 0 : index
    %6 = vector.load %arg11[%c0_6, %c0_7] : memref<18x128xf32, #tpu.memory_space<vmem>>, vector<16x128xf32>
    %7 = arith.truncf %6 : vector<16x128xf32> to vector<16x128xbf16>
    %c0_8 = arith.constant 0 : index
    %c0_9 = arith.constant 0 : index
    %c0_10 = arith.constant 0 : index
    %8 = vector.load %arg2[%c0_8, %c0_9, %c0_10] : memref<3x128x128xbf16, #tpu.memory_space<vmem>>, vector<1x128x128xbf16>
    %9 = vector.shape_cast %8 : vector<1x128x128xbf16> to vector<128x128xbf16>
    %cst_11 = arith.constant dense<0.000000e+00> : vector<16x128xf32>
    %10 = tpu.matmul %7, %9, %cst_11 {dimension_numbers = #tpu.dot_dimension_numbers<[1], [0], [0], [1], [0, 0, 1, 1], [], []>} : vector<16x128xbf16>, vector<128x128xbf16>, vector<16x128xf32> -> vector<16x128xf32>
    %c1_12 = arith.constant 1 : index
    %c0_13 = arith.constant 0 : index
    %11 = vector.load %arg11[%c1_12, %c0_13] : memref<18x128xf32, #tpu.memory_space<vmem>>, vector<16x128xf32>
    %12 = arith.truncf %11 : vector<16x128xf32> to vector<16x128xbf16>
    %c1_14 = arith.constant 1 : index
    %c0_15 = arith.constant 0 : index
    %c0_16 = arith.constant 0 : index
    %13 = vector.load %arg2[%c1_14, %c0_15, %c0_16] : memref<3x128x128xbf16, #tpu.memory_space<vmem>>, vector<1x128x128xbf16>
    %14 = vector.shape_cast %13 : vector<1x128x128xbf16> to vector<128x128xbf16>
    %cst_17 = arith.constant dense<0.000000e+00> : vector<16x128xf32>
    %15 = tpu.matmul %12, %14, %cst_17 {dimension_numbers = #tpu.dot_dimension_numbers<[1], [0], [0], [1], [0, 0, 1, 1], [], []>} : vector<16x128xbf16>, vector<128x128xbf16>, vector<16x128xf32> -> vector<16x128xf32>
    %16 = arith.addf %10, %15 : vector<16x128xf32>
    %c2 = arith.constant 2 : index
    %c0_18 = arith.constant 0 : index
    %17 = vector.load %arg11[%c2, %c0_18] : memref<18x128xf32, #tpu.memory_space<vmem>>, vector<16x128xf32>
    %18 = arith.truncf %17 : vector<16x128xf32> to vector<16x128xbf16>
    %c2_19 = arith.constant 2 : index
    %c0_20 = arith.constant 0 : index
    %c0_21 = arith.constant 0 : index
    %19 = vector.load %arg2[%c2_19, %c0_20, %c0_21] : memref<3x128x128xbf16, #tpu.memory_space<vmem>>, vector<1x128x128xbf16>
    %20 = vector.shape_cast %19 : vector<1x128x128xbf16> to vector<128x128xbf16>
    %cst_22 = arith.constant dense<0.000000e+00> : vector<16x128xf32>
    %21 = tpu.matmul %18, %20, %cst_22 {dimension_numbers = #tpu.dot_dimension_numbers<[1], [0], [0], [1], [0, 0, 1, 1], [], []>} : vector<16x128xbf16>, vector<128x128xbf16>, vector<16x128xf32> -> vector<16x128xf32>
    %22 = arith.addf %16, %21 : vector<16x128xf32>
    %c0_23 = arith.constant 0 : index
    %c0_24 = arith.constant 0 : index
    %23 = vector.load %arg3[%c0_23, %c0_24] : memref<1x128xf32, #tpu.memory_space<vmem>>, vector<1x128xf32>
    %24 = vector.broadcast %23 : vector<1x128xf32> to vector<16x128xf32>
    %25 = arith.addf %22, %24 : vector<16x128xf32>
    %cst_25 = arith.constant 0.000000e+00 : f32
    %26 = vector.broadcast %cst_25 : f32 to vector<16x128xf32>
    %27 = arith.maximumf %25, %26 : vector<16x128xf32>
    %c1_26 = arith.constant 1 : index
    %c0_27 = arith.constant 0 : index
    %28 = vector.load %arg11[%c1_26, %c0_27] : memref<18x128xf32, #tpu.memory_space<vmem>>, vector<16x128xf32>
    tpu.vector_store %arg11[%c1_26, %c0_27], %27 {strides = array<i32>} : memref<18x128xf32, #tpu.memory_space<vmem>>, vector<16x128xf32>,
    %c0_28 = arith.constant 0 : index
    %c0_29 = arith.constant 0 : index
    %29 = vector.load %arg11[%c0_28, %c0_29] : memref<18x128xf32, #tpu.memory_space<vmem>>, vector<16x128xf32>
    %30 = arith.truncf %29 : vector<16x128xf32> to vector<16x128xbf16>
    %c0_30 = arith.constant 0 : index
    %c0_31 = arith.constant 0 : index
    %c0_32 = arith.constant 0 : index
    %31 = vector.load %arg4[%c0_30, %c0_31, %c0_32] : memref<3x128x128xbf16, #tpu.memory_space<vmem>>, vector<1x128x128xbf16>
    %32 = vector.shape_cast %31 : vector<1x128x128xbf16> to vector<128x128xbf16>
    %cst_33 = arith.constant dense<0.000000e+00> : vector<16x128xf32>
    %33 = tpu.matmul %30, %32, %cst_33 {dimension_numbers = #tpu.dot_dimension_numbers<[1], [0], [0], [1], [0, 0, 1, 1], [], []>} : vector<16x128xbf16>, vector<128x128xbf16>, vector<16x128xf32> -> vector<16x128xf32>
    %c1_34 = arith.constant 1 : index
    %c0_35 = arith.constant 0 : index
    %34 = vector.load %arg11[%c1_34, %c0_35] : memref<18x128xf32, #tpu.memory_space<vmem>>, vector<16x128xf32>
    %35 = arith.truncf %34 : vector<16x128xf32> to vector<16x128xbf16>
    %c1_36 = arith.constant 1 : index
    %c0_37 = arith.constant 0 : index
    %c0_38 = arith.constant 0 : index
    %36 = vector.load %arg4[%c1_36, %c0_37, %c0_38] : memref<3x128x128xbf16, #tpu.memory_space<vmem>>, vector<1x128x128xbf16>
    %37 = vector.shape_cast %36 : vector<1x128x128xbf16> to vector<128x128xbf16>
    %cst_39 = arith.constant dense<0.000000e+00> : vector<16x128xf32>
    %38 = tpu.matmul %35, %37, %cst_39 {dimension_numbers = #tpu.dot_dimension_numbers<[1], [0], [0], [1], [0, 0, 1, 1], [], []>} : vector<16x128xbf16>, vector<128x128xbf16>, vector<16x128xf32> -> vector<16x128xf32>
    %39 = arith.addf %33, %38 : vector<16x128xf32>
    %c2_40 = arith.constant 2 : index
    %c0_41 = arith.constant 0 : index
    %40 = vector.load %arg11[%c2_40, %c0_41] : memref<18x128xf32, #tpu.memory_space<vmem>>, vector<16x128xf32>
    %41 = arith.truncf %40 : vector<16x128xf32> to vector<16x128xbf16>
    %c2_42 = arith.constant 2 : index
    %c0_43 = arith.constant 0 : index
    %c0_44 = arith.constant 0 : index
    %42 = vector.load %arg4[%c2_42, %c0_43, %c0_44] : memref<3x128x128xbf16, #tpu.memory_space<vmem>>, vector<1x128x128xbf16>
    %43 = vector.shape_cast %42 : vector<1x128x128xbf16> to vector<128x128xbf16>
    %cst_45 = arith.constant dense<0.000000e+00> : vector<16x128xf32>
    %44 = tpu.matmul %41, %43, %cst_45 {dimension_numbers = #tpu.dot_dimension_numbers<[1], [0], [0], [1], [0, 0, 1, 1], [], []>} : vector<16x128xbf16>, vector<128x128xbf16>, vector<16x128xf32> -> vector<16x128xf32>
    %45 = arith.addf %39, %44 : vector<16x128xf32>
    %c0_46 = arith.constant 0 : index
    %c0_47 = arith.constant 0 : index
    %46 = vector.load %arg5[%c0_46, %c0_47] : memref<1x128xf32, #tpu.memory_space<vmem>>, vector<1x128xf32>
    %47 = vector.broadcast %46 : vector<1x128xf32> to vector<16x128xf32>
    %48 = arith.addf %45, %47 : vector<16x128xf32>
    %cst_48 = arith.constant 0.000000e+00 : f32
    %49 = vector.broadcast %cst_48 : f32 to vector<16x128xf32>
    %50 = arith.maximumf %48, %49 : vector<16x128xf32>
    %51 = arith.addf %4, %50 : vector<16x128xf32>
    %cst_49 = arith.constant 0.000000e+00 : f32
    %52 = vector.broadcast %cst_49 : f32 to vector<16x128xf32>
    %53 = arith.maximumf %51, %52 : vector<16x128xf32>
    %54 = arith.truncf %53 : vector<16x128xf32> to vector<16x128xbf16>
    %c0_50 = arith.constant 0 : index
    %c0_51 = arith.constant 0 : index
    %55 = vector.load %arg6[%c0_50, %c0_51] : memref<128x128xbf16, #tpu.memory_space<vmem>>, vector<128x128xbf16>
    %cst_52 = arith.constant dense<0.000000e+00> : vector<16x128xf32>
    %56 = tpu.matmul %54, %55, %cst_52 {dimension_numbers = #tpu.dot_dimension_numbers<[1], [0], [0], [1], [0, 0, 1, 1], [], []>} : vector<16x128xbf16>, vector<128x128xbf16>, vector<16x128xf32> -> vector<16x128xf32>
    %c0_53 = arith.constant 0 : index
    %c0_54 = arith.constant 0 : index
    %57 = vector.load %arg7[%c0_53, %c0_54] : memref<1x128xf32, #tpu.memory_space<vmem>>, vector<1x128xf32>
    %58 = vector.broadcast %57 : vector<1x128xf32> to vector<16x128xf32>
    %59 = arith.addf %56, %58 : vector<16x128xf32>
    %cst_55 = arith.constant 0.000000e+00 : f32
    %60 = vector.broadcast %cst_55 : f32 to vector<16x128xf32>
    %61 = arith.maximumf %59, %60 : vector<16x128xf32>
    %62 = arith.truncf %61 : vector<16x128xf32> to vector<16x128xbf16>
    %c0_56 = arith.constant 0 : index
    %c0_57 = arith.constant 0 : index
    %63 = vector.load %arg8[%c0_56, %c0_57] : memref<128x16xbf16, #tpu.memory_space<vmem>>, vector<128x16xbf16>
    %cst_58 = arith.constant dense<0.000000e+00> : vector<16x16xf32>
    %64 = tpu.matmul %62, %63, %cst_58 {dimension_numbers = #tpu.dot_dimension_numbers<[1], [0], [0], [1], [0, 0, 1, 1], [], []>} : vector<16x128xbf16>, vector<128x16xbf16>, vector<16x16xf32> -> vector<16x16xf32>
    %c0_59 = arith.constant 0 : index
    %65 = memref.load %arg9[%c0_59] : memref<1xf32, #tpu.memory_space<smem>>
    %66 = vector.broadcast %65 : f32 to vector<16x16xf32>
    %67 = arith.addf %64, %66 : vector<16x16xf32>
    %c0_60 = arith.constant 0 : index
    %c0_61 = arith.constant 0 : index
    %c0_62 = arith.constant 0 : index
    %68 = vector.load %arg10[%c0_60, %c0_61, %c0_62] : memref<2x16x16xf32, #tpu.memory_space<vmem>>, vector<1x16x16xf32>
    %69 = vector.shape_cast %68 : vector<1x16x16xf32> to vector<16x16xf32>
    %70 = vector.shape_cast %67 : vector<16x16xf32> to vector<1x16x16xf32>
    tpu.vector_store %arg10[%c0_60, %c0_61, %c0_62], %70 {strides = array<i32>} : memref<2x16x16xf32, #tpu.memory_space<vmem>>, vector<1x16x16xf32>,
    %c1_63 = arith.constant 1 : index
    %c0_64 = arith.constant 0 : index
    %c0_65 = arith.constant 0 : index
    %71 = vector.load %arg1[%c1_63, %c0_64, %c0_65] : memref<2x16x128xf32, #tpu.memory_space<vmem>>, vector<1x16x128xf32>
    %72 = vector.shape_cast %71 : vector<1x16x128xf32> to vector<16x128xf32>
    %c1_66 = arith.constant 1 : index
    %c0_67 = arith.constant 0 : index
    %73 = vector.load %arg11[%c1_66, %c0_67] : memref<18x128xf32, #tpu.memory_space<vmem>>, vector<16x128xf32>
    tpu.vector_store %arg11[%c1_66, %c0_67], %72 {strides = array<i32>} : memref<18x128xf32, #tpu.memory_space<vmem>>, vector<16x128xf32>,
    %c0_68 = arith.constant 0 : index
    %c0_69 = arith.constant 0 : index
    %74 = vector.load %arg11[%c0_68, %c0_69] : memref<18x128xf32, #tpu.memory_space<vmem>>, vector<16x128xf32>
    %75 = arith.truncf %74 : vector<16x128xf32> to vector<16x128xbf16>
    %c0_70 = arith.constant 0 : index
    %c0_71 = arith.constant 0 : index
    %c0_72 = arith.constant 0 : index
    %76 = vector.load %arg2[%c0_70, %c0_71, %c0_72] : memref<3x128x128xbf16, #tpu.memory_space<vmem>>, vector<1x128x128xbf16>
    %77 = vector.shape_cast %76 : vector<1x128x128xbf16> to vector<128x128xbf16>
    %cst_73 = arith.constant dense<0.000000e+00> : vector<16x128xf32>
    %78 = tpu.matmul %75, %77, %cst_73 {dimension_numbers = #tpu.dot_dimension_numbers<[1], [0], [0], [1], [0, 0, 1, 1], [], []>} : vector<16x128xbf16>, vector<128x128xbf16>, vector<16x128xf32> -> vector<16x128xf32>
    %c1_74 = arith.constant 1 : index
    %c0_75 = arith.constant 0 : index
    %79 = vector.load %arg11[%c1_74, %c0_75] : memref<18x128xf32, #tpu.memory_space<vmem>>, vector<16x128xf32>
    %80 = arith.truncf %79 : vector<16x128xf32> to vector<16x128xbf16>
    %c1_76 = arith.constant 1 : index
    %c0_77 = arith.constant 0 : index
    %c0_78 = arith.constant 0 : index
    %81 = vector.load %arg2[%c1_76, %c0_77, %c0_78] : memref<3x128x128xbf16, #tpu.memory_space<vmem>>, vector<1x128x128xbf16>
    %82 = vector.shape_cast %81 : vector<1x128x128xbf16> to vector<128x128xbf16>
    %cst_79 = arith.constant dense<0.000000e+00> : vector<16x128xf32>
    %83 = tpu.matmul %80, %82, %cst_79 {dimension_numbers = #tpu.dot_dimension_numbers<[1], [0], [0], [1], [0, 0, 1, 1], [], []>} : vector<16x128xbf16>, vector<128x128xbf16>, vector<16x128xf32> -> vector<16x128xf32>
    %84 = arith.addf %78, %83 : vector<16x128xf32>
    %c2_80 = arith.constant 2 : index
    %c0_81 = arith.constant 0 : index
    %85 = vector.load %arg11[%c2_80, %c0_81] : memref<18x128xf32, #tpu.memory_space<vmem>>, vector<16x128xf32>
    %86 = arith.truncf %85 : vector<16x128xf32> to vector<16x128xbf16>
    %c2_82 = arith.constant 2 : index
    %c0_83 = arith.constant 0 : index
    %c0_84 = arith.constant 0 : index
    %87 = vector.load %arg2[%c2_82, %c0_83, %c0_84] : memref<3x128x128xbf16, #tpu.memory_space<vmem>>, vector<1x128x128xbf16>
    %88 = vector.shape_cast %87 : vector<1x128x128xbf16> to vector<128x128xbf16>
    %cst_85 = arith.constant dense<0.000000e+00> : vector<16x128xf32>
    %89 = tpu.matmul %86, %88, %cst_85 {dimension_numbers = #tpu.dot_dimension_numbers<[1], [0], [0], [1], [0, 0, 1, 1], [], []>} : vector<16x128xbf16>, vector<128x128xbf16>, vector<16x128xf32> -> vector<16x128xf32>
    %90 = arith.addf %84, %89 : vector<16x128xf32>
    %c0_86 = arith.constant 0 : index
    %c0_87 = arith.constant 0 : index
    %91 = vector.load %arg3[%c0_86, %c0_87] : memref<1x128xf32, #tpu.memory_space<vmem>>, vector<1x128xf32>
    %92 = vector.broadcast %91 : vector<1x128xf32> to vector<16x128xf32>
    %93 = arith.addf %90, %92 : vector<16x128xf32>
    %cst_88 = arith.constant 0.000000e+00 : f32
    %94 = vector.broadcast %cst_88 : f32 to vector<16x128xf32>
    %95 = arith.maximumf %93, %94 : vector<16x128xf32>
    %c1_89 = arith.constant 1 : index
    %c0_90 = arith.constant 0 : index
    %96 = vector.load %arg11[%c1_89, %c0_90] : memref<18x128xf32, #tpu.memory_space<vmem>>, vector<16x128xf32>
    tpu.vector_store %arg11[%c1_89, %c0_90], %95 {strides = array<i32>} : memref<18x128xf32, #tpu.memory_space<vmem>>, vector<16x128xf32>,
    %c0_91 = arith.constant 0 : index
    %c0_92 = arith.constant 0 : index
    %97 = vector.load %arg11[%c0_91, %c0_92] : memref<18x128xf32, #tpu.memory_space<vmem>>, vector<16x128xf32>
    %98 = arith.truncf %97 : vector<16x128xf32> to vector<16x128xbf16>
    %c0_93 = arith.constant 0 : index
    %c0_94 = arith.constant 0 : index
    %c0_95 = arith.constant 0 : index
    %99 = vector.load %arg4[%c0_93, %c0_94, %c0_95] : memref<3x128x128xbf16, #tpu.memory_space<vmem>>, vector<1x128x128xbf16>
    %100 = vector.shape_cast %99 : vector<1x128x128xbf16> to vector<128x128xbf16>
    %cst_96 = arith.constant dense<0.000000e+00> : vector<16x128xf32>
    %101 = tpu.matmul %98, %100, %cst_96 {dimension_numbers = #tpu.dot_dimension_numbers<[1], [0], [0], [1], [0, 0, 1, 1], [], []>} : vector<16x128xbf16>, vector<128x128xbf16>, vector<16x128xf32> -> vector<16x128xf32>
    %c1_97 = arith.constant 1 : index
    %c0_98 = arith.constant 0 : index
    %102 = vector.load %arg11[%c1_97, %c0_98] : memref<18x128xf32, #tpu.memory_space<vmem>>, vector<16x128xf32>
    %103 = arith.truncf %102 : vector<16x128xf32> to vector<16x128xbf16>
    %c1_99 = arith.constant 1 : index
    %c0_100 = arith.constant 0 : index
    %c0_101 = arith.constant 0 : index
    %104 = vector.load %arg4[%c1_99, %c0_100, %c0_101] : memref<3x128x128xbf16, #tpu.memory_space<vmem>>, vector<1x128x128xbf16>
    %105 = vector.shape_cast %104 : vector<1x128x128xbf16> to vector<128x128xbf16>
    %cst_102 = arith.constant dense<0.000000e+00> : vector<16x128xf32>
    %106 = tpu.matmul %103, %105, %cst_102 {dimension_numbers = #tpu.dot_dimension_numbers<[1], [0], [0], [1], [0, 0, 1, 1], [], []>} : vector<16x128xbf16>, vector<128x128xbf16>, vector<16x128xf32> -> vector<16x128xf32>
    %107 = arith.addf %101, %106 : vector<16x128xf32>
    %c2_103 = arith.constant 2 : index
    %c0_104 = arith.constant 0 : index
    %108 = vector.load %arg11[%c2_103, %c0_104] : memref<18x128xf32, #tpu.memory_space<vmem>>, vector<16x128xf32>
    %109 = arith.truncf %108 : vector<16x128xf32> to vector<16x128xbf16>
    %c2_105 = arith.constant 2 : index
    %c0_106 = arith.constant 0 : index
    %c0_107 = arith.constant 0 : index
    %110 = vector.load %arg4[%c2_105, %c0_106, %c0_107] : memref<3x128x128xbf16, #tpu.memory_space<vmem>>, vector<1x128x128xbf16>
    %111 = vector.shape_cast %110 : vector<1x128x128xbf16> to vector<128x128xbf16>
    %cst_108 = arith.constant dense<0.000000e+00> : vector<16x128xf32>
    %112 = tpu.matmul %109, %111, %cst_108 {dimension_numbers = #tpu.dot_dimension_numbers<[1], [0], [0], [1], [0, 0, 1, 1], [], []>} : vector<16x128xbf16>, vector<128x128xbf16>, vector<16x128xf32> -> vector<16x128xf32>
    %113 = arith.addf %107, %112 : vector<16x128xf32>
    %c0_109 = arith.constant 0 : index
    %c0_110 = arith.constant 0 : index
    %114 = vector.load %arg5[%c0_109, %c0_110] : memref<1x128xf32, #tpu.memory_space<vmem>>, vector<1x128xf32>
    %115 = vector.broadcast %114 : vector<1x128xf32> to vector<16x128xf32>
    %116 = arith.addf %113, %115 : vector<16x128xf32>
    %cst_111 = arith.constant 0.000000e+00 : f32
    %117 = vector.broadcast %cst_111 : f32 to vector<16x128xf32>
    %118 = arith.maximumf %116, %117 : vector<16x128xf32>
    %119 = arith.addf %72, %118 : vector<16x128xf32>
    %cst_112 = arith.constant 0.000000e+00 : f32
    %120 = vector.broadcast %cst_112 : f32 to vector<16x128xf32>
    %121 = arith.maximumf %119, %120 : vector<16x128xf32>
    %122 = arith.truncf %121 : vector<16x128xf32> to vector<16x128xbf16>
    %c0_113 = arith.constant 0 : index
    %c0_114 = arith.constant 0 : index
    %123 = vector.load %arg6[%c0_113, %c0_114] : memref<128x128xbf16, #tpu.memory_space<vmem>>, vector<128x128xbf16>
    %cst_115 = arith.constant dense<0.000000e+00> : vector<16x128xf32>
    %124 = tpu.matmul %122, %123, %cst_115 {dimension_numbers = #tpu.dot_dimension_numbers<[1], [0], [0], [1], [0, 0, 1, 1], [], []>} : vector<16x128xbf16>, vector<128x128xbf16>, vector<16x128xf32> -> vector<16x128xf32>
    %c0_116 = arith.constant 0 : index
    %c0_117 = arith.constant 0 : index
    %125 = vector.load %arg7[%c0_116, %c0_117] : memref<1x128xf32, #tpu.memory_space<vmem>>, vector<1x128xf32>
    %126 = vector.broadcast %125 : vector<1x128xf32> to vector<16x128xf32>
    %127 = arith.addf %124, %126 : vector<16x128xf32>
    %cst_118 = arith.constant 0.000000e+00 : f32
    %128 = vector.broadcast %cst_118 : f32 to vector<16x128xf32>
    %129 = arith.maximumf %127, %128 : vector<16x128xf32>
    %130 = arith.truncf %129 : vector<16x128xf32> to vector<16x128xbf16>
    %c0_119 = arith.constant 0 : index
    %c0_120 = arith.constant 0 : index
    %131 = vector.load %arg8[%c0_119, %c0_120] : memref<128x16xbf16, #tpu.memory_space<vmem>>, vector<128x16xbf16>
    %cst_121 = arith.constant dense<0.000000e+00> : vector<16x16xf32>
    %132 = tpu.matmul %130, %131, %cst_121 {dimension_numbers = #tpu.dot_dimension_numbers<[1], [0], [0], [1], [0, 0, 1, 1], [], []>} : vector<16x128xbf16>, vector<128x16xbf16>, vector<16x16xf32> -> vector<16x16xf32>
    %c0_122 = arith.constant 0 : index
    %133 = memref.load %arg9[%c0_122] : memref<1xf32, #tpu.memory_space<smem>>
    %134 = vector.broadcast %133 : f32 to vector<16x16xf32>
    %135 = arith.addf %132, %134 : vector<16x16xf32>
    %c1_123 = arith.constant 1 : index
    %c0_124 = arith.constant 0 : index
    %c0_125 = arith.constant 0 : index
    %136 = vector.load %arg10[%c1_123, %c0_124, %c0_125] : memref<2x16x16xf32, #tpu.memory_space<vmem>>, vector<1x16x16xf32>
    %137 = vector.shape_cast %136 : vector<1x16x16xf32> to vector<16x16xf32>
    %138 = vector.shape_cast %135 : vector<16x16xf32> to vector<1x16x16xf32>
    tpu.vector_store %arg10[%c1_123, %c0_124, %c0_125], %138 {strides = array<i32>} : memref<2x16x16xf32, #tpu.memory_space<vmem>>, vector<1x16x16xf32>,
    return
  }
  func.func @transform_0(%arg0: i32) -> (i32, i32, i32) {
    %c0_i32 = arith.constant 0 : i32
    %c0_i32_0 = arith.constant 0 : i32
    %c0_i32_1 = arith.constant 0 : i32
    return %arg0, %c0_i32, %c0_i32_0 : i32, i32, i32
  }
  func.func @transform_1(%arg0: i32) -> (i32, i32, i32) {
    %c0_i32 = arith.constant 0 : i32
    %c0_i32_0 = arith.constant 0 : i32
    %c0_i32_1 = arith.constant 0 : i32
    %c0_i32_2 = arith.constant 0 : i32
    return %c0_i32, %c0_i32_0, %c0_i32_1 : i32, i32, i32
  }
  func.func @transform_2(%arg0: i32) -> (i32, i32) {
    %c0_i32 = arith.constant 0 : i32
    %c0_i32_0 = arith.constant 0 : i32
    %c0_i32_1 = arith.constant 0 : i32
    return %c0_i32, %c0_i32_0 : i32, i32
  }
  func.func @transform_3(%arg0: i32) -> (i32, i32, i32) {
    %c0_i32 = arith.constant 0 : i32
    %c0_i32_0 = arith.constant 0 : i32
    %c0_i32_1 = arith.constant 0 : i32
    %c0_i32_2 = arith.constant 0 : i32
    return %c0_i32, %c0_i32_0, %c0_i32_1 : i32, i32, i32
  }
  func.func @transform_4(%arg0: i32) -> (i32, i32) {
    %c0_i32 = arith.constant 0 : i32
    %c0_i32_0 = arith.constant 0 : i32
    %c0_i32_1 = arith.constant 0 : i32
    return %c0_i32, %c0_i32_0 : i32, i32
  }
  func.func @transform_5(%arg0: i32) -> (i32, i32) {
    %c0_i32 = arith.constant 0 : i32
    %c0_i32_0 = arith.constant 0 : i32
    %c0_i32_1 = arith.constant 0 : i32
    return %c0_i32, %c0_i32_0 : i32, i32
  }
  func.func @transform_6(%arg0: i32) -> (i32, i32) {
    %c0_i32 = arith.constant 0 : i32
    %c0_i32_0 = arith.constant 0 : i32
    %c0_i32_1 = arith.constant 0 : i32
    return %c0_i32, %c0_i32_0 : i32, i32
  }
  func.func @transform_7(%arg0: i32) -> (i32, i32) {
    %c0_i32 = arith.constant 0 : i32
    %c0_i32_0 = arith.constant 0 : i32
    %c0_i32_1 = arith.constant 0 : i32
    return %c0_i32, %c0_i32_0 : i32, i32
  }
  func.func @transform_8(%arg0: i32) -> i32 {
    %c0_i32 = arith.constant 0 : i32
    %c0_i32_0 = arith.constant 0 : i32
    return %c0_i32 : i32
  }
  func.func @transform_9(%arg0: i32) -> (i32, i32, i32) {
    %c0_i32 = arith.constant 0 : i32
    %c0_i32_0 = arith.constant 0 : i32
    %c0_i32_1 = arith.constant 0 : i32
    return %arg0, %c0_i32, %c0_i32_0 : i32, i32, i32
  }
}

</mosaic_0001>

<bundles_post_ra>
// kernel: tpu_custom_call.1
= control target key start
LH: loop header
LB: loop body
LE: loop exit
PB: predicated region body
PF: predicated region fallthrough
CT: control target
= control target key end

     0   :  { %15 = vsyncpa [#allocation5], 0  ;;  %s3145_s0 = inlined_call_operand.hbm [shape: f32[2,16,128], index: 0, kind: input, shape index: {}]   ;;  %s3146_s1 = inlined_call_operand.hbm [shape: bf16[3,128,128], index: 1, kind: input, shape index: {}]   ;;  %s3147_s2 = inlined_call_operand.vmem [shape: f32[1,128], index: 2, kind: input, shape index: {}]   ;;  %s3148_s3 = inlined_call_operand.hbm [shape: bf16[3,128,128], index: 3, kind: input, shape index: {}]   ;;  %s3149_s4 = inlined_call_operand.vmem [shape: f32[1,128], index: 4, kind: input, shape index: {}]   ;;  %s3150_s5 = inlined_call_operand.vmem [shape: bf16[128,128], index: 5, kind: input, shape index: {}]   ;;  %s3151_s6 = inlined_call_operand.vmem [shape: f32[1,128], index: 6, kind: input, shape index: {}]   ;;  %s3152_s7 = inlined_call_operand.vmem [shape: bf16[128,16], index: 7, kind: input, shape index: {}]   ;;  %s3153_s8 = inlined_call_operand.<no memory space> [shape: f32[1], index: 8, kind: input, shape index: {}]   ;;  %s3154_s9 = inlined_call_operand.hbm [shape: f32[2,16,16], index: 9, kind: output, shape index: {}]  }
   0x1   :  { %16 = vsyncpa [#allocation8], 0 }
   0x2   :  { %17 = vsyncpa [#allocation6], 0  ;;  %s2743_s30 = smov [#allocation7]  }
   0x3   :  { %s35_s10 = sshll.u32 %s2743_s30, 4  ;;  %s36_s10 = int_to_ptr.vmem [resolvable:$true] %s35_s10 }
   0x4   :  { %s2665_s11 = scalar_lea.vmem %s36_s10, 3072  ;;  %p2670_p1 = scmp.lt.s32.totalorder %s36_s10, %s36_s10 }
   0x5   :  { %p2666_p0 = scmp.ne.s32.totalorder %s36_s10, %s2665_s11  ;;  %p2671_p2 = scmp.lt.s32.totalorder %s2665_s11, %s2665_s11 }
   0x7   :  { %p2672_p3 = por %p2671_p2, %p2670_p1 }
   0x9   :  { %p2673_p4 = pnand %p2672_p3, %p2666_p0 }
   0xb   :  { %2676 = shalt.err (!%p2673_p4)
}
   0xc   :  { %s2744_s12 = smov 64   ;;  %s2745_s13 = smov 4  }
   0xd   :  { %41 = dma.hbm_to_vmem [thread:$0]  %s3146_s1, 3072, %s36_s10, [#allocation8], %s2744_s12, %s2744_s12, %s2745_s13  }
   0xe   :  { %s2746_s16 = smov [#allocation4]  }
   0xf   :  { %s23_s17 = sshll.u32 %s2746_s16, 4  ;;  %s24_s17 = int_to_ptr.vmem [resolvable:$true] %s23_s17 }
  0x10   :  { %s2685_s18 = scalar_lea.vmem %s24_s17, 512  ;;  %p2690_p6 = scmp.lt.s32.totalorder %s24_s17, %s24_s17 }
  0x11   :  { %p2686_p5 = scmp.ne.s32.totalorder %s24_s17, %s2685_s18  ;;  %p2691_p7 = scmp.lt.s32.totalorder %s2685_s18, %s2685_s18 }
  0x13   :  { %p2692_p8 = por %p2691_p7, %p2690_p6 }
  0x15   :  { %p2693_p9 = pnand %p2692_p8, %p2686_p5 }
  0x17   :  { %2696 = shalt.err (!%p2693_p9)
}
  0x18   :  { %s2747_s19 = smov 128   ;;  %s2748_s20 = smov 8  }
  0x19   :  { %29 = dma.hbm_to_vmem [thread:$0]  %s3145_s0, 512, %s24_s17, [#allocation5], %s2747_s19, %s2747_s19, %s2748_s20  }
  0x1a   :  { %s2749_s1 = smov [#allocation9]  }
  0x1b   :  { %s49_s23 = sshll.u32 %s2749_s1, 4  ;;  %s50_s23 = int_to_ptr.vmem [resolvable:$true] %s49_s23 }
  0x1c   :  { %s2705_s24 = scalar_lea.vmem %s50_s23, 3072  ;;  %p2710_p11 = scmp.lt.s32.totalorder %s50_s23, %s50_s23 }
  0x1d   :  { %p2706_p10 = scmp.ne.s32.totalorder %s50_s23, %s2705_s24  ;;  %p2711_p12 = scmp.lt.s32.totalorder %s2705_s24, %s2705_s24 }
  0x1f   :  { %p2712_p13 = por %p2711_p12, %p2710_p11 }
  0x21   :  { %p2713_p0 = pnand %p2712_p13, %p2706_p10 }
  0x23   :  { %2716 = shalt.err (!%p2713_p0)
}
  0x24   :  { %55 = dma.hbm_to_vmem [thread:$0]  %s3148_s3, 3072, %s50_s23, [#allocation8], %s2744_s12, %s2744_s12, %s2745_s13  }
  0x25   :  { %2737 = dma.done.wait [#allocation5], 512  }
  0x26   :  { %2738 = vsyncadd [#allocation5], 4294966784 }
  0x27   :  { %2739 = dma.done.wait [#allocation8], 6144  }
  0x28   :  { %2740 = vsyncadd [#allocation8], 4294961152  ;;  %v2750_v0 = vmov 0.0   ;;  %vm2751_vm0 = vmmov 0   ;;  %v2529_v1 = vld [vmem:[#allocation7 + $0x78] sm:$0xff]   ;;  %v2531_v3 = vld [vmem:[#allocation7 + $0x70] sm:$0xff]  }
  0x29   :  { %2199 = vmatprep.subr.bf16.mxu0 %v2750_v0  ;;  %76 = vst [vmem:[#allocation2] sm:$0x1] %v2750_v0  ;;  %77 = vst [vmem:[#allocation2 + $0x11] sm:$0x1] %v2750_v0  ;;  %2219 = vmatprep.subr.bf16.mxu1 %v2750_v0  ;;  %v2530_v2 = vld [vmem:[#allocation7 + $0x38] sm:$0xff]   ;;  %v2532_v4 = vld [vmem:[#allocation7 + $0x30] sm:$0xff]  }
  0x2a   :  { %2215 = vmatprep.mubr.msk.bf16.mxu0 %vm2751_vm0, %v2750_v0  ;;  %2235 = vmatprep.mubr.msk.bf16.mxu1 %vm2751_vm0, %v2750_v0  ;;  %v2533_v5 = vld [vmem:[#allocation7 + $0x68] sm:$0xff]   ;;  %v2535_v7 = vld [vmem:[#allocation7 + $0x60] sm:$0xff]   ;;  %v2537_v9 = vld [vmem:[#allocation7 + $0x58] sm:$0xff]   ;;  %vm989_vm1 = vcmask 130048   ;;  %s2752_s23 = smov [#allocation10]  }
  0x2b   :  { %2200 = vmatpush3.bf16.msra.mxu0 %v2529_v1  ;;  %2220 = vmatpush3.bf16.msra.mxu1 %v2530_v2  ;;  %v2534_v6 = vld [vmem:[#allocation7 + $0x28] sm:$0xff]   ;;  %v2536_v8 = vld [vmem:[#allocation7 + $0x20] sm:$0xff]   ;;  %v2538_v10 = vld [vmem:[#allocation7 + $0x18] sm:$0xff]   ;;  %s1908_s24 = sshll.u32 %s2752_s23, 4  ;;  %s1909_s24 = int_to_ptr.vmem [resolvable:$true] %s1908_s24 }
  0x2c   :  { %2201 = vmatprep.subr.bf16.mxu0 %v2750_v0  ;;  %2221 = vmatprep.subr.bf16.mxu1 %v2750_v0  ;;  %v2831_v11 = vld [vmem:[#allocation4] sm:$0xff]  ;;  %v2833_v12 = vld [vmem:[#allocation4 + $0x8] sm:$0xff]  ;;  %v2539_v13 = vld [vmem:[#allocation7 + $0x50] sm:$0xff]   ;;  %p2722_p2 = scmp.lt.s32.totalorder %s1909_s24, %s1909_s24 }
  0x2d   :  { %80 = vst [vmem:[#allocation2 + $0x1] sm:$0xff] %v2831_v11  ;;  %81 = vst [vmem:[#allocation2 + $0x9] sm:$0xff] %v2833_v12  ;;  %v2540_v14 = vld [vmem:[#allocation7 + $0x10] sm:$0xff]   ;;  %v2541_v15 = vld [vmem:[#allocation7 + $0x48] sm:$0xff]   ;;  %v103_v22 = vpack.c.bf16 %v2833_v12, %v2831_v11 }
  0x2e   :  { %v2542_v16 = vld [vmem:[#allocation7 + $0x8] sm:$0xff]   ;;  %v2543_v17 = vld [vmem:[#allocation7 + $0x40] sm:$0xff]   ;;  %v2545_v21 = vld [vmem:[#allocation7 + $0xb8] sm:$0xff]  }
  0x2f   :  { %2202 = vmatpush3.bf16.msra.mxu0 %v2531_v3  ;;  %2222 = vmatpush3.bf16.msra.mxu1 %v2532_v4  ;;  %v2544_v18 = vld [vmem:[#allocation7] sm:$0xff]   ;;  %v2546_v24 = vld [vmem:[#allocation7 + $0xb0] sm:$0xff]   ;;  %v2547_v25 = vld [vmem:[#allocation7 + $0xa8] sm:$0xff]  }
  0x30   :  { %2203 = vmatprep.subr.bf16.mxu0 %v2750_v0  ;;  %2223 = vmatprep.subr.bf16.mxu1 %v2750_v0  ;;  %v2548_v26 = vld [vmem:[#allocation7 + $0xa0] sm:$0xff]   ;;  %v2549_v27 = vld [vmem:[#allocation7 + $0x98] sm:$0xff]   ;;  %v2550_v28 = vld [vmem:[#allocation7 + $0x90] sm:$0xff]  }
  0x31   :  { %v2551_v29 = vld [vmem:[#allocation7 + $0x88] sm:$0xff]   ;;  %v2552_v30 = vld [vmem:[#allocation7 + $0x80] sm:$0xff]   ;;  %v2553_v34 = vld [vmem:[#allocation9 + $0x78] sm:$0xff]  }
  0x32   :  { %v2554_v35 = vld [vmem:[#allocation9 + $0x38] sm:$0xff]   ;;  %v2555_v36 = vld [vmem:[#allocation9 + $0x70] sm:$0xff]   ;;  %v2557_v38 = vld [vmem:[#allocation9 + $0x68] sm:$0xff]  }
  0x33   :  { %2204 = vmatpush3.bf16.msra.mxu0 %v2533_v5  ;;  %2224 = vmatpush3.bf16.msra.mxu1 %v2534_v6  ;;  %v2556_v37 = vld [vmem:[#allocation9 + $0x30] sm:$0xff]   ;;  %v2558_v39 = vld [vmem:[#allocation9 + $0x28] sm:$0xff]   ;;  %v2559_v40 = vld [vmem:[#allocation9 + $0x60] sm:$0xff]  }
  0x34   :  { %2205 = vmatprep.subr.bf16.mxu0 %v2750_v0  ;;  %2225 = vmatprep.subr.bf16.mxu1 %v2750_v0  ;;  %v82_v19 = vld [vmem:[#allocation2] sm:$0xff]  ;;  %v83_v20 = vld [vmem:[#allocation2 + $0x8] sm:$0xff]  ;;  %v2561_v41 = vld [vmem:[#allocation9 + $0x58] sm:$0xff]  }
  0x35   :  { %v84_v23 = vpack.c.bf16 %v83_v20, %v82_v19  ;;  %v299_v31 = vld [vmem:[#allocation2 + $0x2] sm:$0xff]  ;;  %v300_v32 = vld [vmem:[#allocation2 + $0xa] sm:$0xff]  ;;  %v2560_v43 = vld [vmem:[#allocation9 + $0x20] sm:$0xff]  }
  0x36   :  { %v301_v33 = vpack.c.bf16 %v300_v32, %v299_v31  ;;  %v2563_v42 = vld [vmem:[#allocation9 + $0x50] sm:$0xff]   ;;  %v2565_v44 = vld [vmem:[#allocation9 + $0x48] sm:$0xff]   ;;  %v2562_v45 = vld [vmem:[#allocation9 + $0x18] sm:$0xff]  }
  0x37   :  { %2206 = vmatpush3.bf16.msra.mxu0 %v2535_v7  ;;  %2226 = vmatpush3.bf16.msra.mxu1 %v2536_v8  ;;  %v2567_v46 = vld [vmem:[#allocation9 + $0x40] sm:$0xff]   ;;  %v2564_v47 = vld [vmem:[#allocation9 + $0x10] sm:$0xff]   ;;  %v2566_v48 = vld [vmem:[#allocation9 + $0x8] sm:$0xff]  }
  0x38   :  { %2207 = vmatprep.subr.bf16.mxu0 %v2750_v0  ;;  %2227 = vmatprep.subr.bf16.mxu1 %v2750_v0  ;;  %v2568_v49 = vld [vmem:[#allocation9] sm:$0xff]   ;;  %v2880_v60 = vld [vmem:[%s3147_s2] ss:$0 sm:$0xff]  ;;  %v2569_v8 = vld [vmem:[#allocation9 + $0xb8] sm:$0xff]  }
  0x39   :  { %v2581_v31 = vld [vmem:[%s3150_s5 + $0x18] sm:$0xff]   ;;  %v2582_v32 = vld [vmem:[%s3150_s5 + $0x10] sm:$0xff]  }
  0x3b   :  { %2208 = vmatpush3.bf16.msra.mxu0 %v2537_v9  ;;  %2228 = vmatpush3.bf16.msra.mxu1 %v2538_v10  ;;  %v2570_v10 = vld [vmem:[#allocation9 + $0xb0] sm:$0xff]  }
  0x3c   :  { %2209 = vmatprep.subr.bf16.mxu0 %v2750_v0  ;;  %2229 = vmatprep.subr.bf16.mxu1 %v2750_v0 }
  0x3f   :  { %2210 = vmatpush3.bf16.msra.mxu0 %v2539_v13  ;;  %2230 = vmatpush3.bf16.msra.mxu1 %v2540_v14  ;;  %v2571_v13 = vld [vmem:[#allocation9 + $0xa8] sm:$0xff]  }
  0x40   :  { %2211 = vmatprep.subr.bf16.mxu0 %v2750_v0  ;;  %2231 = vmatprep.subr.bf16.mxu1 %v2750_v0 }
  0x43   :  { %2212 = vmatpush3.bf16.msra.mxu0 %v2541_v15  ;;  %2232 = vmatpush3.bf16.msra.mxu1 %v2542_v16  ;;  %v2887_v15 = vld [vmem:[#allocation4 + $0x10] sm:$0xff]  ;;  %v2889_v16 = vld [vmem:[#allocation4 + $0x18] sm:$0xff] }
  0x44   :  { %2213 = vmatprep.subr.bf16.mxu0 %v2750_v0  ;;  %2233 = vmatprep.subr.bf16.mxu1 %v2750_v0 }
  0x47   :  { %2214 = vmatpush3.bf16.msra.mxu0 %v2543_v17  ;;  %2234 = vmatpush3.bf16.msra.mxu1 %v2544_v18 }
  0x48   :  { %2239 = vmatprep.subr.bf16.mxu0 %v2750_v0  ;;  %2259 = vmatprep.subr.bf16.mxu1 %v2750_v0 }
  0x4a   :  { %2216 = vmatmul.mubr.bf16.vlgmr.msra.gmra.mxu0 %v103_v22  ;;  %2236 = vmatmul.mubr.bf16.vlgmr.msra.gmra.mxu1 %v84_v23  ;;  %v2573_v22 = vld [vmem:[#allocation9 + $0x98] sm:$0xff]   ;;  %v2574_v23 = vld [vmem:[#allocation9 + $0x90] sm:$0xff]  }
  0x4b   :  { %2240 = vmatpush3.bf16.msra.mxu0 %v2545_v21  ;;  %2255 = vmatprep.mubr.msk.bf16.mxu0 %vm2751_vm0, %v2750_v0  ;;  %v2572_v21 = vld [vmem:[#allocation9 + $0xa0] sm:$0xff]  }
  0x4c   :  { %2241 = vmatprep.subr.bf16.mxu0 %v2750_v0  ;;  %2275 = vmatprep.mubr.msk.bf16.mxu1 %vm2751_vm0, %v2750_v0 }
  0x4d   :  { %2260 = vmatpush3.bf16.msra.mxu1 %v2553_v34  ;;  %v2584_v34 = vld [vmem:[%s3150_s5] sm:$0xff]  }
  0x4e   :  { %2261 = vmatprep.subr.bf16.mxu1 %v2750_v0 }
  0x4f   :  { %2242 = vmatpush3.bf16.msra.mxu0 %v2546_v24  ;;  %v2575_v24 = vld [vmem:[#allocation9 + $0x88] sm:$0xff]  }
  0x50   :  { %2243 = vmatprep.subr.bf16.mxu0 %v2750_v0 }
  0x51   :  { %2262 = vmatpush3.bf16.msra.mxu1 %v2555_v36  ;;  %v2588_v36 = vld [vmem:[%s3152_s7 + $0x30] sm:$0xff]  }
  0x52   :  { %2263 = vmatprep.subr.bf16.mxu1 %v2750_v0 }
  0x53   :  { %2244 = vmatpush3.bf16.msra.mxu0 %v2547_v25  ;;  %v2576_v25 = vld [vmem:[#allocation9 + $0x80] sm:$0xff]  }
  0x54   :  { %2245 = vmatprep.subr.bf16.mxu0 %v2750_v0 }
  0x55   :  { %2264 = vmatpush3.bf16.msra.mxu1 %v2557_v38  ;;  %v2592_v38 = vld [vmem:[%s3152_s7 + $0x20] sm:$0xff]  }
  0x56   :  { %2265 = vmatprep.subr.bf16.mxu1 %v2750_v0 }
  0x57   :  { %2246 = vmatpush3.bf16.msra.mxu0 %v2548_v26 }
  0x58   :  { %2247 = vmatprep.subr.bf16.mxu0 %v2750_v0 }
  0x59   :  { %2266 = vmatpush3.bf16.msra.mxu1 %v2559_v40  ;;  %v2596_v40 = vld [vmem:[%s3152_s7 + $0x10] sm:$0xff]  }
  0x5a   :  { %2267 = vmatprep.subr.bf16.mxu1 %v2750_v0 }
  0x5b   :  { %2248 = vmatpush3.bf16.msra.mxu0 %v2549_v27  ;;  %v2577_v27 = vld [vmem:[%s3150_s5 + $0x38] sm:$0xff]  }
  0x5c   :  { %2249 = vmatprep.subr.bf16.mxu0 %v2750_v0 }
  0x5d   :  { %2268 = vmatpush3.bf16.msra.mxu1 %v2561_v41 }
  0x5e   :  { %2269 = vmatprep.subr.bf16.mxu1 %v2750_v0 }
  0x5f   :  { %2250 = vmatpush3.bf16.msra.mxu0 %v2550_v28  ;;  %v2578_v28 = vld [vmem:[%s3150_s5 + $0x30] sm:$0xff]  }
  0x60   :  { %2251 = vmatprep.subr.bf16.mxu0 %v2750_v0 }
  0x61   :  { %2270 = vmatpush3.bf16.msra.mxu1 %v2563_v42 }
  0x62   :  { %2271 = vmatprep.subr.bf16.mxu1 %v2750_v0 }
  0x63   :  { %2252 = vmatpush3.bf16.msra.mxu0 %v2551_v29  ;;  %v2579_v29 = vld [vmem:[%s3150_s5 + $0x28] sm:$0xff]  }
  0x64   :  { %2253 = vmatprep.subr.bf16.mxu0 %v2750_v0 }
  0x65   :  { %2272 = vmatpush3.bf16.msra.mxu1 %v2565_v44 }
  0x66   :  { %2273 = vmatprep.subr.bf16.mxu1 %v2750_v0 }
  0x67   :  { %2254 = vmatpush3.bf16.msra.mxu0 %v2552_v30  ;;  %v2580_v30 = vld [vmem:[%s3150_s5 + $0x20] sm:$0xff]  }
  0x68   :  { %2279 = vmatprep.subr.bf16.mxu0 %v2750_v0 }
  0x69   :  { %2274 = vmatpush3.bf16.msra.mxu1 %v2567_v46 }
  0x6a   :  { %2256 = vmatmul.mubr.bf16.vlgmr.msra.gmra.mxu0 %v301_v33  ;;  %2299 = vmatprep.subr.bf16.mxu1 %v2750_v0  ;;  %v2583_v33 = vld [vmem:[%s3150_s5 + $0x8] sm:$0xff]  }
  0x6b   :  { %2295 = vmatprep.mubr.msk.bf16.mxu0 %vm2751_vm0, %v2750_v0  ;;  %2280 = vmatpush3.bf16.msra.mxu0 %v2554_v35  ;;  %v2586_v35 = vld [vmem:[%s3152_s7 + $0x38] sm:$0xff]  }
  0x6c   :  { %2281 = vmatprep.subr.bf16.mxu0 %v2750_v0 }
  0x6f   :  { %2282 = vmatpush3.bf16.msra.mxu0 %v2556_v37  ;;  %v2590_v37 = vld [vmem:[%s3152_s7 + $0x28] sm:$0xff]  }
  0x70   :  { %2283 = vmatprep.subr.bf16.mxu0 %v2750_v0 }
  0x73   :  { %2284 = vmatpush3.bf16.msra.mxu0 %v2558_v39  ;;  %v2594_v39 = vld [vmem:[%s3152_s7 + $0x18] sm:$0xff]  }
  0x74   :  { %2285 = vmatprep.subr.bf16.mxu0 %v2750_v0 }
  0x77   :  { %2286 = vmatpush3.bf16.msra.mxu0 %v2560_v43 }
  0x78   :  { %2287 = vmatprep.subr.bf16.mxu0 %v2750_v0 }
  0x7b   :  { %2288 = vmatpush3.bf16.msra.mxu0 %v2562_v45 }
  0x7c   :  { %2289 = vmatprep.subr.bf16.mxu0 %v2750_v0 }
  0x7f   :  { %2290 = vmatpush3.bf16.msra.mxu0 %v2564_v47 }
  0x80   :  { %2291 = vmatprep.subr.bf16.mxu0 %v2750_v0 }
  0x83   :  { %2292 = vmatpush3.bf16.msra.mxu0 %v2566_v48 }
  0x84   :  { %2293 = vmatprep.subr.bf16.mxu0 %v2750_v0 }
  0x87   :  { %2294 = vmatpush3.bf16.msra.mxu0 %v2568_v49 }
  0x88   :  { %2319 = vmatprep.subr.bf16.mxu0 %v2750_v0 }
 0x10a   :  { %v203_v50 = vpop.f32.mrf.mxu0  ;;  %v292_v51 = vpop.f32.mrf.mxu1 }
 0x10b   :  { %v293_v58 = vadd.f32 %v292_v51, %v203_v50  ;;  %v2963_v51 = vld [vmem:[%s3149_s4] ss:$0 sm:$0xff] }
 0x10c   :  { %v2217_v52 = vpop.f32.mrf.mxu0  ;;  %v2237_v53 = vpop.f32.mrf.mxu1 }
 0x10e   :  { %v206_v54 = vpop.f32.mrf.mxu0  ;;  %v295_v55 = vpop.f32.mrf.mxu1 }
 0x10f   :  { %v296_v63 = vadd.f32 %v295_v55, %v206_v54 }
 0x110   :  { %v2218_v56 = vpop.f32.mrf.mxu0  ;;  %v2238_v57 = vpop.f32.mrf.mxu1 }
 0x12a   :  { %v401_v59 = vpop.f32.mrf.mxu0 }
 0x12b   :  { %v408_v61 = vadd.f32 %v401_v59, %v293_v58 }
 0x12c   :  { %v2257_v62 = vpop.f32.mrf.mxu0 }
 0x12d   :  { %v417_v1 = vadd.f32 %v2880_v60, %v408_v61 }
 0x12e   :  { %v404_v2 = vpop.f32.mrf.mxu0 }
 0x12f   :  { %v419_v3 = vmax.f32 %v417_v1, 0.0  ;;  %v409_v4 = vadd.f32 %v404_v2, %v296_v63 }
 0x130   :  { %v2258_v5 = vpop.f32.mrf.mxu0 }
 0x131   :  { %421 = vst [vmem:[#allocation2 + $0x1] sm:$0xff] %v419_v3  ;;  %v418_v6 = vadd.f32 %v2880_v60, %v409_v4  ;;  %v2585_v4 = vld [vmem:[#allocation7 + $0x78] sm:$0xff]  }
 0x133   :  { %v420_v7 = vmax.f32 %v418_v6, 0.0  ;;  %v2587_v6 = vld [vmem:[#allocation7 + $0x70] sm:$0xff]  }
 0x135   :  { %422 = vst [vmem:[#allocation2 + $0x9] sm:$0xff] %v420_v7  ;;  %v444_v9 = vpack.c.bf16 %v420_v7, %v419_v3  ;;  %v2589_v7 = vld [vmem:[#allocation7 + $0x68] sm:$0xff]  }
 0x137   :  { %2276 = vmatmul.mubr.bf16.vlgmr.msra.gmra.mxu1 %v444_v9  ;;  %v2597_v9 = vld [vmem:[#allocation7 + $0x48] sm:$0xff]  }
 0x138   :  { %2300 = vmatpush3.bf16.msra.mxu1 %v2569_v8  ;;  %2315 = vmatprep.mubr.msk.bf16.mxu1 %vm2751_vm0, %v2750_v0  ;;  %v423_v14 = vld [vmem:[#allocation2] sm:$0xff]  ;;  %v2595_v8 = vld [vmem:[#allocation7 + $0x50] sm:$0xff]  }
 0x139   :  { %2301 = vmatprep.subr.bf16.mxu1 %v2750_v0 }
 0x13c   :  { %v424_v17 = vld [vmem:[#allocation2 + $0x8] sm:$0xff]  ;;  %2302 = vmatpush3.bf16.msra.mxu1 %v2570_v10 }
 0x13d   :  { %v640_v18 = vld [vmem:[#allocation2 + $0x2] sm:$0xff]  ;;  %v641_v19 = vld [vmem:[#allocation2 + $0xa] sm:$0xff]  ;;  %v425_v20 = vpack.c.bf16 %v424_v17, %v423_v14  ;;  %2303 = vmatprep.subr.bf16.mxu1 %v2750_v0  ;;  %v1018_v17 = vpack.c.bf16 %v2889_v16, %v2887_v15 }
 0x13e   :  { %995 = vst [vmem:[#allocation2 + $0x1] sm:$0xff] %v2887_v15  ;;  %996 = vst [vmem:[#allocation2 + $0x9] sm:$0xff] %v2889_v16  ;;  %v642_v26 = vpack.c.bf16 %v641_v19, %v640_v18  ;;  %v2598_v10 = vld [vmem:[%s3152_s7 + $0x8] sm:$0xff]   ;;  %v2600_v14 = vld [vmem:[%s3152_s7] sm:$0xff]  }
 0x13f   :  { %2296 = vmatmul.mubr.bf16.vlgmr.msra.gmra.mxu0 %v425_v20  ;;  %v2601_v18 = vld [vmem:[#allocation7 + $0xb8] sm:$0xff]   ;;  %v2603_v19 = vld [vmem:[#allocation7 + $0xb0] sm:$0xff]   ;;  %v2605_v20 = vld [vmem:[#allocation7 + $0xa8] sm:$0xff]  }
 0x140   :  { %2304 = vmatpush3.bf16.msra.mxu1 %v2571_v13  ;;  %2335 = vmatprep.mubr.msk.bf16.mxu0 %vm2751_vm0, %v2750_v0  ;;  %v2599_v13 = vld [vmem:[#allocation7 + $0x40] sm:$0xff]  }
 0x141   :  { %2305 = vmatprep.subr.bf16.mxu1 %v2750_v0  ;;  %2320 = vmatpush3.bf16.msra.mxu0 %v2577_v27 }
 0x142   :  { %2321 = vmatprep.subr.bf16.mxu0 %v2750_v0 }
 0x144   :  { %2306 = vmatpush3.bf16.msra.mxu1 %v2572_v21  ;;  %v2607_v21 = vld [vmem:[#allocation7 + $0xa0] sm:$0xff]  }
 0x145   :  { %2307 = vmatprep.subr.bf16.mxu1 %v2750_v0  ;;  %2322 = vmatpush3.bf16.msra.mxu0 %v2578_v28  ;;  %v1214_v27 = vld [vmem:[#allocation2 + $0xa] sm:$0xff] }
 0x146   :  { %2323 = vmatprep.subr.bf16.mxu0 %v2750_v0 }
 0x148   :  { %2308 = vmatpush3.bf16.msra.mxu1 %v2573_v22  ;;  %v2609_v22 = vld [vmem:[#allocation7 + $0x98] sm:$0xff]  }
 0x149   :  { %2309 = vmatprep.subr.bf16.mxu1 %v2750_v0  ;;  %2324 = vmatpush3.bf16.msra.mxu0 %v2579_v29  ;;  %v3004_v29 = vld [vmem:[%s3151_s6] ss:$0 sm:$0xff] }
 0x14a   :  { %2325 = vmatprep.subr.bf16.mxu0 %v2750_v0 }
 0x14c   :  { %2310 = vmatpush3.bf16.msra.mxu1 %v2574_v23  ;;  %v2611_v23 = vld [vmem:[#allocation7 + $0x90] sm:$0xff]  }
 0x14d   :  { %2311 = vmatprep.subr.bf16.mxu1 %v2750_v0  ;;  %2326 = vmatpush3.bf16.msra.mxu0 %v2580_v30 }
 0x14e   :  { %2327 = vmatprep.subr.bf16.mxu0 %v2750_v0 }
 0x150   :  { %2312 = vmatpush3.bf16.msra.mxu1 %v2575_v24  ;;  %v2613_v24 = vld [vmem:[#allocation7 + $0x88] sm:$0xff]  }
 0x151   :  { %2313 = vmatprep.subr.bf16.mxu1 %v2750_v0  ;;  %2328 = vmatpush3.bf16.msra.mxu0 %v2581_v31 }
 0x152   :  { %2329 = vmatprep.subr.bf16.mxu0 %v2750_v0 }
 0x154   :  { %2314 = vmatpush3.bf16.msra.mxu1 %v2576_v25  ;;  %v2615_v25 = vld [vmem:[#allocation7 + $0x80] sm:$0xff]  }
 0x155   :  { %2339 = vmatprep.subr.bf16.mxu1 %v2750_v0  ;;  %2330 = vmatpush3.bf16.msra.mxu0 %v2582_v32 }
 0x156   :  { %2331 = vmatprep.subr.bf16.mxu0 %v2750_v0 }
 0x157   :  { %2316 = vmatmul.mubr.bf16.vlgmr.msra.gmra.mxu1 %v642_v26  ;;  %v1213_v26 = vld [vmem:[#allocation2 + $0x2] sm:$0xff] }
 0x158   :  { %2355 = vmatprep.mubr.msk.bf16.mxu1 %vm2751_vm0, %v2750_v0  ;;  %2340 = vmatpush3.bf16.msra.mxu1 %v2586_v35  ;;  %v1215_v28 = vpack.c.bf16 %v1214_v27, %v1213_v26 }
 0x159   :  { %2332 = vmatpush3.bf16.msra.mxu0 %v2583_v33  ;;  %2341 = vmatprep.subr.bf16.mxu1 %v2750_v0 }
 0x15a   :  { %2333 = vmatprep.subr.bf16.mxu0 %v2750_v0 }
 0x15c   :  { %2342 = vmatpush3.bf16.msra.mxu1 %v2588_v36 }
 0x15d   :  { %2334 = vmatpush3.bf16.msra.mxu0 %v2584_v34  ;;  %2343 = vmatprep.subr.bf16.mxu1 %v2750_v0 }
 0x15e   :  { %2359 = vmatprep.subr.bf16.mxu0 %v2750_v0 }
 0x160   :  { %2344 = vmatpush3.bf16.msra.mxu1 %v2590_v37 }
 0x161   :  { %2345 = vmatprep.subr.bf16.mxu1 %v2750_v0 }
 0x164   :  { %2346 = vmatpush3.bf16.msra.mxu1 %v2592_v38  ;;  %v2602_v38 = vld [vmem:[#allocation7 + $0x38] sm:$0xff]  }
 0x165   :  { %2347 = vmatprep.subr.bf16.mxu1 %v2750_v0 }
 0x168   :  { %2348 = vmatpush3.bf16.msra.mxu1 %v2594_v39 }
 0x169   :  { %2349 = vmatprep.subr.bf16.mxu1 %v2750_v0 }
 0x16c   :  { %2350 = vmatpush3.bf16.msra.mxu1 %v2596_v40  ;;  %v2604_v40 = vld [vmem:[#allocation7 + $0x30] sm:$0xff]  }
 0x16d   :  { %2351 = vmatprep.subr.bf16.mxu1 %v2750_v0 }
 0x170   :  { %2352 = vmatpush3.bf16.msra.mxu1 %v2598_v10  ;;  %v2632_v10 = vld [vmem:[#allocation9] sm:$0xff]  }
 0x171   :  { %2353 = vmatprep.subr.bf16.mxu1 %v2750_v0 }
 0x174   :  { %2354 = vmatpush3.bf16.msra.mxu1 %v2600_v14 }
 0x175   :  { %2379 = vmatprep.subr.bf16.mxu1 %v2750_v0 }
 0x1f7   :  { %v544_v41 = vpop.f32.mrf.mxu1 }
 0x1f9   :  { %v2277_v42 = vpop.f32.mrf.mxu1 }
 0x1fa   :  { %v2608_v42 = vld [vmem:[#allocation7 + $0x20] sm:$0xff]  }
 0x1fb   :  { %v547_v43 = vpop.f32.mrf.mxu1 }
 0x1fd   :  { %v2278_v44 = vpop.f32.mrf.mxu1 }
 0x1fe   :  { %v2612_v44 = vld [vmem:[#allocation7 + $0x10] sm:$0xff]  }
 0x1ff   :  { %v633_v45 = vpop.f32.mrf.mxu0 }
 0x200   :  { %v634_v49 = vadd.f32 %v633_v45, %v544_v41  ;;  %v2606_v41 = vld [vmem:[#allocation7 + $0x28] sm:$0xff]  }
 0x201   :  { %v2297_v46 = vpop.f32.mrf.mxu0  ;;  %v2614_v45 = vld [vmem:[#allocation7 + $0x8] sm:$0xff]  }
 0x202   :  { %v2616_v46 = vld [vmem:[#allocation7] sm:$0xff]  }
 0x203   :  { %v636_v47 = vpop.f32.mrf.mxu0 }
 0x204   :  { %v637_v54 = vadd.f32 %v636_v47, %v547_v43  ;;  %v2610_v43 = vld [vmem:[#allocation7 + $0x18] sm:$0xff]   ;;  %v997_v47 = vld [vmem:[#allocation2] sm:$0xff] }
 0x205   :  { %v2298_v48 = vpop.f32.mrf.mxu0 }
 0x206   :  { %v998_v48 = vld [vmem:[#allocation2 + $0x8] sm:$0xff] }
 0x217   :  { %v742_v50 = vpop.f32.mrf.mxu1 }
 0x218   :  { %v749_v52 = vadd.f32 %v742_v50, %v634_v49  ;;  %v999_v49 = vpack.c.bf16 %v998_v48, %v997_v47 }
 0x219   :  { %v2317_v53 = vpop.f32.mrf.mxu1 }
 0x21a   :  { %v758_v55 = vadd.f32 %v2963_v51, %v749_v52 }
 0x21b   :  { %v745_v56 = vpop.f32.mrf.mxu1 }
 0x21c   :  { %v760_v57 = vmax.f32 %v758_v55, 0.0  ;;  %v750_v58 = vadd.f32 %v745_v56, %v637_v54  ;;  %v2617_v55 = vld [vmem:[#allocation9 + $0x78] sm:$0xff]  }
 0x21d   :  { %v2318_v59 = vpop.f32.mrf.mxu1  ;;  %v2618_v56 = vld [vmem:[#allocation9 + $0x38] sm:$0xff]  }
 0x21e   :  { %v759_v61 = vadd.f32 %v2963_v51, %v750_v58  ;;  %v762_v62 = vadd.f32 %v760_v57, %v2831_v11  ;;  %v2591_v11 = vld [vmem:[#allocation7 + $0x60] sm:$0xff]   ;;  %v2619_v57 = vld [vmem:[#allocation9 + $0x70] sm:$0xff]   ;;  %v2621_v59 = vld [vmem:[#allocation9 + $0x68] sm:$0xff]  }
 0x21f   :  { %v2620_v58 = vld [vmem:[#allocation9 + $0x30] sm:$0xff]  }
 0x220   :  { %v761_v63 = vmax.f32 %v759_v61, 0.0  ;;  %v764_v2 = vmax.f32 %v762_v62, 0.0  ;;  %v2623_v61 = vld [vmem:[#allocation9 + $0x60] sm:$0xff]  }
 0x222   :  { %v763_v1 = vadd.f32 %v761_v63, %v2833_v12  ;;  %v2593_v12 = vld [vmem:[#allocation7 + $0x58] sm:$0xff]  }
 0x223   :  { %v2625_v63 = vld [vmem:[#allocation9 + $0x58] sm:$0xff]  }
 0x224   :  { %v765_v3 = vmax.f32 %v763_v1, 0.0 }
 0x226   :  { %v766_v5 = vpack.c.bf16 %v765_v3, %v764_v2  ;;  %v2622_v2 = vld [vmem:[#allocation9 + $0x28] sm:$0xff]  }
 0x228   :  { %2336 = vmatmul.mubr.bf16.vlgmr.msra.gmra.mxu0 %v766_v5 }
 0x229   :  { %2360 = vmatpush3.bf16.msra.mxu0 %v2585_v4  ;;  %2375 = vmatprep.mubr.msk.bf16.mxu0 %vm2751_vm0, %v2750_v0  ;;  %v2627_v4 = vld [vmem:[#allocation9 + $0x50] sm:$0xff]  }
 0x22a   :  { %2361 = vmatprep.subr.bf16.mxu0 %v2750_v0 }
 0x22d   :  { %2362 = vmatpush3.bf16.msra.mxu0 %v2587_v6  ;;  %v2624_v6 = vld [vmem:[#allocation9 + $0x20] sm:$0xff]  }
 0x22e   :  { %2363 = vmatprep.subr.bf16.mxu0 %v2750_v0 }
 0x231   :  { %2364 = vmatpush3.bf16.msra.mxu0 %v2589_v7  ;;  %v2629_v7 = vld [vmem:[#allocation9 + $0x48] sm:$0xff]  }
 0x232   :  { %2365 = vmatprep.subr.bf16.mxu0 %v2750_v0 }
 0x235   :  { %2366 = vmatpush3.bf16.msra.mxu0 %v2591_v11  ;;  %v2626_v11 = vld [vmem:[#allocation9 + $0x18] sm:$0xff]  }
 0x236   :  { %2367 = vmatprep.subr.bf16.mxu0 %v2750_v0 }
 0x239   :  { %2368 = vmatpush3.bf16.msra.mxu0 %v2593_v12  ;;  %v2631_v12 = vld [vmem:[#allocation9 + $0x40] sm:$0xff]  }
 0x23a   :  { %2369 = vmatprep.subr.bf16.mxu0 %v2750_v0 }
 0x23d   :  { %2370 = vmatpush3.bf16.msra.mxu0 %v2595_v8  ;;  %v2628_v8 = vld [vmem:[#allocation9 + $0x10] sm:$0xff]  }
 0x23e   :  { %2371 = vmatprep.subr.bf16.mxu0 %v2750_v0 }
 0x241   :  { %2372 = vmatpush3.bf16.msra.mxu0 %v2597_v9  ;;  %v2630_v9 = vld [vmem:[#allocation9 + $0x8] sm:$0xff]  }
 0x242   :  { %2373 = vmatprep.subr.bf16.mxu0 %v2750_v0 }
 0x245   :  { %2374 = vmatpush3.bf16.msra.mxu0 %v2599_v13  ;;  %v3043_v13 = vstv %s3153_s8 }
 0x246   :  { %2399 = vmatprep.subr.bf16.mxu0 %v2750_v0 }
 0x248   :  { %2376 = vmatmul.mubr.bf16.vlgmr.msra.gmra.mxu0 %v1018_v17 }
 0x249   :  { %2400 = vmatpush3.bf16.msra.mxu0 %v2601_v18  ;;  %2415 = vmatprep.mubr.msk.bf16.mxu0 %vm2751_vm0, %v2750_v0 }
 0x24a   :  { %2401 = vmatprep.subr.bf16.mxu0 %v2750_v0 }
 0x24d   :  { %2402 = vmatpush3.bf16.msra.mxu0 %v2603_v19 }
 0x24e   :  { %2403 = vmatprep.subr.bf16.mxu0 %v2750_v0 }
 0x251   :  { %2404 = vmatpush3.bf16.msra.mxu0 %v2605_v20 }
 0x252   :  { %2405 = vmatprep.subr.bf16.mxu0 %v2750_v0 }
 0x255   :  { %2406 = vmatpush3.bf16.msra.mxu0 %v2607_v21 }
 0x256   :  { %2407 = vmatprep.subr.bf16.mxu0 %v2750_v0 }
 0x259   :  { %2408 = vmatpush3.bf16.msra.mxu0 %v2609_v22 }
 0x25a   :  { %2409 = vmatprep.subr.bf16.mxu0 %v2750_v0 }
 0x25d   :  { %2410 = vmatpush3.bf16.msra.mxu0 %v2611_v23 }
 0x25e   :  { %2411 = vmatprep.subr.bf16.mxu0 %v2750_v0 }
 0x261   :  { %2412 = vmatpush3.bf16.msra.mxu0 %v2613_v24 }
 0x262   :  { %2413 = vmatprep.subr.bf16.mxu0 %v2750_v0 }
 0x265   :  { %2414 = vmatpush3.bf16.msra.mxu0 %v2615_v25 }
 0x266   :  { %2439 = vmatprep.subr.bf16.mxu0 %v2750_v0 }
 0x268   :  { %2416 = vmatmul.mubr.bf16.vlgmr.msra.gmra.mxu0 %v1215_v28 }
 0x269   :  { %2455 = vmatprep.mubr.msk.bf16.mxu0 %vm2751_vm0, %v2750_v0  ;;  %2440 = vmatpush3.bf16.msra.mxu0 %v2618_v56  ;;  %v2647_v56 = vld [vmem:[%s3150_s5 + $0x8] sm:$0xff]  }
 0x26a   :  { %2441 = vmatprep.subr.bf16.mxu0 %v2750_v0 }
 0x26d   :  { %2442 = vmatpush3.bf16.msra.mxu0 %v2620_v58  ;;  %v2649_v58 = vld [vmem:[%s3152_s7 + $0x38] sm:$0xff]  }
 0x26e   :  { %2443 = vmatprep.subr.bf16.mxu0 %v2750_v0 }
 0x271   :  { %2444 = vmatpush3.bf16.msra.mxu0 %v2622_v2 }
 0x272   :  { %2445 = vmatprep.subr.bf16.mxu0 %v2750_v0 }
 0x275   :  { %2446 = vmatpush3.bf16.msra.mxu0 %v2624_v6 }
 0x276   :  { %2447 = vmatprep.subr.bf16.mxu0 %v2750_v0 }
 0x279   :  { %2448 = vmatpush3.bf16.msra.mxu0 %v2626_v11 }
 0x27a   :  { %2449 = vmatprep.subr.bf16.mxu0 %v2750_v0 }
 0x27d   :  { %2450 = vmatpush3.bf16.msra.mxu0 %v2628_v8 }
 0x27e   :  { %2451 = vmatprep.subr.bf16.mxu0 %v2750_v0 }
 0x281   :  { %2452 = vmatpush3.bf16.msra.mxu0 %v2630_v9 }
 0x282   :  { %2453 = vmatprep.subr.bf16.mxu0 %v2750_v0 }
 0x285   :  { %2454 = vmatpush3.bf16.msra.mxu0 %v2632_v10 }
 0x286   :  { %2479 = vmatprep.subr.bf16.mxu0 %v2750_v0 }
 0x2e8   :  { %v872_v30 = vpop.f32.mrf.mxu0 }
 0x2e9   :  { %v873_v32 = vadd.f32 %v3004_v29, %v872_v30 }
 0x2ea   :  { %v2337_v31 = vpop.f32.mrf.mxu0 }
 0x2eb   :  { %v879_v36 = vmax.f32 %v873_v32, 0.0 }
 0x2ec   :  { %v875_v33 = vpop.f32.mrf.mxu0 }
 0x2ed   :  { %v876_v34 = vadd.f32 %v3004_v29, %v875_v33 }
 0x2ee   :  { %v2338_v35 = vpop.f32.mrf.mxu0 }
 0x2ef   :  { %v880_v37 = vmax.f32 %v876_v34, 0.0  ;;  %v2633_v35 = vld [vmem:[#allocation9 + $0xb8] sm:$0xff]  }
 0x2f1   :  { %v881_v39 = vpack.c.bf16 %v880_v37, %v879_v36  ;;  %v2634_v37 = vld [vmem:[#allocation9 + $0xb0] sm:$0xff]  }
 0x2f3   :  { %2356 = vmatmul.mubr.bf16.vlgmr.msra.gmra.mxu1 %v881_v39 }
 0x2f4   :  { %2380 = vmatpush3.bf16.msra.mxu1 %v2602_v38  ;;  %2395 = vmatprep.mubr.msk.bf16.mxu1 %vm2751_vm0, %v2750_v0 }
 0x2f5   :  { %2381 = vmatprep.subr.bf16.mxu1 %v2750_v0 }
 0x2f8   :  { %2382 = vmatpush3.bf16.msra.mxu1 %v2604_v40  ;;  %v2635_v40 = vld [vmem:[#allocation9 + $0xa8] sm:$0xff]  }
 0x2f9   :  { %2383 = vmatprep.subr.bf16.mxu1 %v2750_v0 }
 0x2fc   :  { %2384 = vmatpush3.bf16.msra.mxu1 %v2606_v41 }
 0x2fd   :  { %2385 = vmatprep.subr.bf16.mxu1 %v2750_v0 }
 0x300   :  { %2386 = vmatpush3.bf16.msra.mxu1 %v2608_v42  ;;  %v2637_v42 = vld [vmem:[#allocation9 + $0x98] sm:$0xff]  }
 0x301   :  { %2387 = vmatprep.subr.bf16.mxu1 %v2750_v0 }
 0x304   :  { %2388 = vmatpush3.bf16.msra.mxu1 %v2610_v43  ;;  %v2638_v43 = vld [vmem:[#allocation9 + $0x90] sm:$0xff]  }
 0x305   :  { %2389 = vmatprep.subr.bf16.mxu1 %v2750_v0 }
 0x308   :  { %2390 = vmatpush3.bf16.msra.mxu1 %v2612_v44  ;;  %v3020_v50 = vpop.f32.mrf.mxu0  ;;  %v2639_v44 = vld [vmem:[#allocation9 + $0x88] sm:$0xff]  }
 0x309   :  { %2391 = vmatprep.subr.bf16.mxu1 %v2750_v0 }
 0x30a   :  { %v2377_v52 = vpop.f32.mrf.mxu0 }
 0x30b   :  { %v2643_v52 = vld [vmem:[%s3150_s5 + $0x28] sm:$0xff]  }
 0x30c   :  { %2392 = vmatpush3.bf16.msra.mxu1 %v2614_v45  ;;  %v3022_v53 = vpop.f32.mrf.mxu0  ;;  %v2640_v45 = vld [vmem:[#allocation9 + $0x80] sm:$0xff]  }
 0x30d   :  { %2393 = vmatprep.subr.bf16.mxu1 %v2750_v0 }
 0x30e   :  { %v2378_v54 = vpop.f32.mrf.mxu0 }
 0x30f   :  { %v2645_v54 = vld [vmem:[%s3150_s5 + $0x18] sm:$0xff]  }
 0x310   :  { %2394 = vmatpush3.bf16.msra.mxu1 %v2616_v46 }
 0x311   :  { %2419 = vmatprep.subr.bf16.mxu1 %v2750_v0 }
 0x313   :  { %2396 = vmatmul.mubr.bf16.vlgmr.msra.gmra.mxu1 %v999_v49  ;;  %v2641_v49 = vld [vmem:[%s3150_s5 + $0x38] sm:$0xff]  }
 0x314   :  { %2435 = vmatprep.mubr.msk.bf16.mxu1 %vm2751_vm0, %v2750_v0  ;;  %2420 = vmatpush3.bf16.msra.mxu1 %v2617_v55  ;;  %v2646_v55 = vld [vmem:[%s3150_s5 + $0x10] sm:$0xff]  }
 0x315   :  { %2421 = vmatprep.subr.bf16.mxu1 %v2750_v0 }
 0x318   :  { %2422 = vmatpush3.bf16.msra.mxu1 %v2619_v57  ;;  %v2648_v57 = vld [vmem:[%s3150_s5] sm:$0xff]  }
 0x319   :  { %2423 = vmatprep.subr.bf16.mxu1 %v2750_v0 }
 0x31c   :  { %2424 = vmatpush3.bf16.msra.mxu1 %v2621_v59  ;;  %v2650_v59 = vld [vmem:[%s3152_s7 + $0x30] sm:$0xff]  }
 0x31d   :  { %2425 = vmatprep.subr.bf16.mxu1 %v2750_v0 }
 0x320   :  { %2426 = vmatpush3.bf16.msra.mxu1 %v2623_v61  ;;  %v2651_v61 = vld [vmem:[%s3152_s7 + $0x28] sm:$0xff]  }
 0x321   :  { %2427 = vmatprep.subr.bf16.mxu1 %v2750_v0 }
 0x324   :  { %2428 = vmatpush3.bf16.msra.mxu1 %v2625_v63  ;;  %v2653_v63 = vld [vmem:[%s3152_s7 + $0x18] sm:$0xff]  }
 0x325   :  { %2429 = vmatprep.subr.bf16.mxu1 %v2750_v0 }
 0x328   :  { %v1314_v62 = vpop.f32.mrf.mxu0  ;;  %2430 = vmatpush3.bf16.msra.mxu1 %v2627_v4 }
 0x329   :  { %2431 = vmatprep.subr.bf16.mxu1 %v2750_v0 }
 0x32a   :  { %v2417_v1 = vpop.f32.mrf.mxu0 }
 0x32c   :  { %v1317_v3 = vpop.f32.mrf.mxu0  ;;  %2432 = vmatpush3.bf16.msra.mxu1 %v2629_v7 }
 0x32d   :  { %2433 = vmatprep.subr.bf16.mxu1 %v2750_v0 }
 0x32e   :  { %v2418_v5 = vpop.f32.mrf.mxu0 }
 0x330   :  { %2434 = vmatpush3.bf16.msra.mxu1 %v2631_v12 }
 0x331   :  { %2459 = vmatprep.subr.bf16.mxu1 %v2750_v0 }
 0x3b3   :  { %v982_v14 = vpop.f32.mrf.mxu1 }
 0x3b4   :  { %v983_v17 = vadd.f32 %v982_v14, %v3043_v13 }
 0x3b5   :  { %v2357_v18 = vpop.f32.mrf.mxu1 }
 0x3b6   :  { %990 = vst.msk [vmem:[#allocation10] sm:$0xff] %vm989_vm1, %v983_v17 }
 0x3b7   :  { %v985_v19 = vpop.f32.mrf.mxu1 }
 0x3b8   :  { %v986_v20 = vadd.f32 %v985_v19, %v3043_v13 }
 0x3b9   :  { %v2358_v21 = vpop.f32.mrf.mxu1 }
 0x3ba   :  { %991 = vst.msk [vmem:[#allocation10 + $0x8] sm:$0xff] %vm989_vm1, %v986_v20 }
 0x3d3   :  { %v1206_v22 = vpop.f32.mrf.mxu1 }
 0x3d4   :  { %v1207_v23 = vadd.f32 %v1206_v22, %v3020_v50  ;;  %v2642_v50 = vld [vmem:[%s3150_s5 + $0x30] sm:$0xff]  }
 0x3d5   :  { %v2397_v24 = vpop.f32.mrf.mxu1 }
 0x3d6   :  { %v1321_v25 = vadd.f32 %v1314_v62, %v1207_v23  ;;  %v2652_v62 = vld [vmem:[%s3152_s7 + $0x20] sm:$0xff]  }
 0x3d7   :  { %v1209_v26 = vpop.f32.mrf.mxu1 }
 0x3d8   :  { %v1330_v27 = vadd.f32 %v2880_v60, %v1321_v25  ;;  %v1210_v28 = vadd.f32 %v1209_v26, %v3022_v53  ;;  %v2644_v53 = vld [vmem:[%s3150_s5 + $0x20] sm:$0xff]  }
 0x3d9   :  { %v2398_v30 = vpop.f32.mrf.mxu1 }
 0x3da   :  { %v1332_v31 = vmax.f32 %v1330_v27, 0.0  ;;  %v1322_v32 = vadd.f32 %v1317_v3, %v1210_v28  ;;  %v2654_v30 = vld [vmem:[%s3152_s7 + $0x10] sm:$0xff]  }
 0x3dc   :  { %1334 = vst [vmem:[#allocation2 + $0x1] sm:$0xff] %v1332_v31  ;;  %v1331_v33 = vadd.f32 %v2880_v60, %v1322_v32  ;;  %v2636_v60 = vld [vmem:[#allocation9 + $0xa0] sm:$0xff]  }
 0x3de   :  { %v1333_v34 = vmax.f32 %v1331_v33, 0.0 }
 0x3e0   :  { %1335 = vst [vmem:[#allocation2 + $0x9] sm:$0xff] %v1333_v34  ;;  %v1357_v36 = vpack.c.bf16 %v1333_v34, %v1332_v31 }
 0x3e2   :  { %2436 = vmatmul.mubr.bf16.vlgmr.msra.gmra.mxu1 %v1357_v36 }
 0x3e3   :  { %2460 = vmatpush3.bf16.msra.mxu1 %v2633_v35  ;;  %2475 = vmatprep.mubr.msk.bf16.mxu1 %vm2751_vm0, %v2750_v0  ;;  %v1336_v38 = vld [vmem:[#allocation2] sm:$0xff] }
 0x3e4   :  { %2461 = vmatprep.subr.bf16.mxu1 %v2750_v0 }
 0x3e7   :  { %v1337_v39 = vld [vmem:[#allocation2 + $0x8] sm:$0xff]  ;;  %2462 = vmatpush3.bf16.msra.mxu1 %v2634_v37 }
 0x3e8   :  { %v1338_v41 = vpack.c.bf16 %v1337_v39, %v1336_v38  ;;  %2463 = vmatprep.subr.bf16.mxu1 %v2750_v0  ;;  %v1552_v46 = vld [vmem:[#allocation2 + $0x2] sm:$0xff]  ;;  %v1553_v47 = vld [vmem:[#allocation2 + $0xa] sm:$0xff] }
 0x3e9   :  { %v1554_v48 = vpack.c.bf16 %v1553_v47, %v1552_v46 }
 0x3ea   :  { %2456 = vmatmul.mubr.bf16.vlgmr.msra.gmra.mxu0 %v1338_v41 }
 0x3eb   :  { %2464 = vmatpush3.bf16.msra.mxu1 %v2635_v40  ;;  %2495 = vmatprep.mubr.msk.bf16.mxu0 %vm2751_vm0, %v2750_v0 }
 0x3ec   :  { %2465 = vmatprep.subr.bf16.mxu1 %v2750_v0  ;;  %2480 = vmatpush3.bf16.msra.mxu0 %v2641_v49 }
 0x3ed   :  { %2481 = vmatprep.subr.bf16.mxu0 %v2750_v0 }
 0x3ef   :  { %2466 = vmatpush3.bf16.msra.mxu1 %v2636_v60 }
 0x3f0   :  { %2467 = vmatprep.subr.bf16.mxu1 %v2750_v0  ;;  %2482 = vmatpush3.bf16.msra.mxu0 %v2642_v50 }
 0x3f1   :  { %2483 = vmatprep.subr.bf16.mxu0 %v2750_v0 }
 0x3f3   :  { %2468 = vmatpush3.bf16.msra.mxu1 %v2637_v42 }
 0x3f4   :  { %2469 = vmatprep.subr.bf16.mxu1 %v2750_v0  ;;  %2484 = vmatpush3.bf16.msra.mxu0 %v2643_v52 }
 0x3f5   :  { %2485 = vmatprep.subr.bf16.mxu0 %v2750_v0 }
 0x3f7   :  { %2470 = vmatpush3.bf16.msra.mxu1 %v2638_v43 }
 0x3f8   :  { %2471 = vmatprep.subr.bf16.mxu1 %v2750_v0  ;;  %2486 = vmatpush3.bf16.msra.mxu0 %v2644_v53 }
 0x3f9   :  { %2487 = vmatprep.subr.bf16.mxu0 %v2750_v0 }
 0x3fb   :  { %2472 = vmatpush3.bf16.msra.mxu1 %v2639_v44 }
 0x3fc   :  { %2473 = vmatprep.subr.bf16.mxu1 %v2750_v0  ;;  %2488 = vmatpush3.bf16.msra.mxu0 %v2645_v54 }
 0x3fd   :  { %2489 = vmatprep.subr.bf16.mxu0 %v2750_v0 }
 0x3ff   :  { %2474 = vmatpush3.bf16.msra.mxu1 %v2640_v45 }
 0x400   :  { %2499 = vmatprep.subr.bf16.mxu1 %v2750_v0  ;;  %2490 = vmatpush3.bf16.msra.mxu0 %v2646_v55 }
 0x401   :  { %2491 = vmatprep.subr.bf16.mxu0 %v2750_v0 }
 0x402   :  { %2476 = vmatmul.mubr.bf16.vlgmr.msra.gmra.mxu1 %v1554_v48 }
 0x403   :  { %2515 = vmatprep.mubr.msk.bf16.mxu1 %vm2751_vm0, %v2750_v0  ;;  %2500 = vmatpush3.bf16.msra.mxu1 %v2649_v58 }
 0x404   :  { %2492 = vmatpush3.bf16.msra.mxu0 %v2647_v56  ;;  %2501 = vmatprep.subr.bf16.mxu1 %v2750_v0 }
 0x405   :  { %2493 = vmatprep.subr.bf16.mxu0 %v2750_v0 }
 0x407   :  { %2502 = vmatpush3.bf16.msra.mxu1 %v2650_v59 }
 0x408   :  { %2494 = vmatpush3.bf16.msra.mxu0 %v2648_v57  ;;  %2503 = vmatprep.subr.bf16.mxu1 %v2750_v0 }
 0x40b   :  { %2504 = vmatpush3.bf16.msra.mxu1 %v2651_v61 }
 0x40c   :  { %2505 = vmatprep.subr.bf16.mxu1 %v2750_v0 }
 0x40f   :  { %2506 = vmatpush3.bf16.msra.mxu1 %v2652_v62 }
 0x410   :  { %2507 = vmatprep.subr.bf16.mxu1 %v2750_v0 }
 0x413   :  { %2508 = vmatpush3.bf16.msra.mxu1 %v2653_v63 }
 0x414   :  { %2509 = vmatprep.subr.bf16.mxu1 %v2750_v0 }
 0x417   :  { %2510 = vmatpush3.bf16.msra.mxu1 %v2654_v30 }
 0x418   :  { %2511 = vmatprep.subr.bf16.mxu1 %v2750_v0 }
 0x4a2   :  { %v1456_v1 = vpop.f32.mrf.mxu1 }
 0x4a4   :  { %v2437_v2 = vpop.f32.mrf.mxu1 }
 0x4a6   :  { %v1459_v3 = vpop.f32.mrf.mxu1 }
 0x4a8   :  { %v2438_v4 = vpop.f32.mrf.mxu1 }
 0x4aa   :  { %v1545_v5 = vpop.f32.mrf.mxu0 }
 0x4ab   :  { %v1546_v12 = vadd.f32 %v1545_v5, %v1456_v1 }
 0x4ac   :  { %v2457_v6 = vpop.f32.mrf.mxu0 }
 0x4ae   :  { %v1548_v7 = vpop.f32.mrf.mxu0 }
 0x4af   :  { %v1549_v14 = vadd.f32 %v1548_v7, %v1459_v3 }
 0x4b0   :  { %v2458_v11 = vpop.f32.mrf.mxu0 }
 0x4c2   :  { %v1653_v8 = vpop.f32.mrf.mxu1 }
 0x4c3   :  { %v1660_v9 = vadd.f32 %v1653_v8, %v1546_v12 }
 0x4c4   :  { %v2477_v10 = vpop.f32.mrf.mxu1 }
 0x4c5   :  { %v1669_v17 = vadd.f32 %v2963_v51, %v1660_v9 }
 0x4c6   :  { %v1656_v18 = vpop.f32.mrf.mxu1 }
 0x4c7   :  { %v1671_v19 = vmax.f32 %v1669_v17, 0.0  ;;  %v1661_v20 = vadd.f32 %v1656_v18, %v1549_v14 }
 0x4c8   :  { %v2478_v21 = vpop.f32.mrf.mxu1 }
 0x4c9   :  { %v1670_v22 = vadd.f32 %v2963_v51, %v1661_v20  ;;  %v1673_v23 = vadd.f32 %v1671_v19, %v2887_v15  ;;  %v2655_v51 = vld [vmem:[%s3152_s7 + $0x8] sm:$0xff]   ;;  %v2656_v15 = vld [vmem:[%s3152_s7] sm:$0xff]   ;;  %s2717_s7 = scalar_lea.vmem %s1909_s24, 512 }
 0x4ca   :  { %2512 = vmatpush3.bf16.msra.mxu1 %v2655_v51  ;;  %p2718_p1 = scmp.ne.s32.totalorder %s1909_s24, %s2717_s7  ;;  %p2723_p3 = scmp.lt.s32.totalorder %s2717_s7, %s2717_s7 }
 0x4cb   :  { %v1672_v24 = vmax.f32 %v1670_v22, 0.0  ;;  %v1675_v26 = vmax.f32 %v1673_v23, 0.0  ;;  %2513 = vmatprep.subr.bf16.mxu1 %v2750_v0 }
 0x4cc   :  { %p2724_p4 = por %p2723_p3, %p2722_p2 }
 0x4cd   :  { %v1674_v25 = vadd.f32 %v1672_v24, %v2889_v16 }
 0x4ce   :  { %2514 = vmatpush3.bf16.msra.mxu1 %v2656_v15  ;;  %p2725_p5 = pnand %p2724_p4, %p2718_p1 }
 0x4cf   :  { %v1676_v27 = vmax.f32 %v1674_v25, 0.0 }
 0x4d1   :  { %v1677_v28 = vpack.c.bf16 %v1676_v27, %v1675_v26 }
 0x4d3   :  { %2496 = vmatmul.mubr.bf16.vlgmr.msra.gmra.mxu0 %v1677_v28 }
 0x593   :  { %v1783_v16 = vpop.f32.mrf.mxu0 }
 0x594   :  { %v1784_v32 = vadd.f32 %v3004_v29, %v1783_v16 }
 0x595   :  { %v2497_v31 = vpop.f32.mrf.mxu0 }
 0x596   :  { %v1790_v36 = vmax.f32 %v1784_v32, 0.0 }
 0x597   :  { %v1786_v33 = vpop.f32.mrf.mxu0 }
 0x598   :  { %v1787_v34 = vadd.f32 %v3004_v29, %v1786_v33 }
 0x599   :  { %v2498_v35 = vpop.f32.mrf.mxu0 }
 0x59a   :  { %v1791_v37 = vmax.f32 %v1787_v34, 0.0 }
 0x59c   :  { %v1792_v38 = vpack.c.bf16 %v1791_v37, %v1790_v36 }
 0x59e   :  { %2516 = vmatmul.mubr.bf16.vlgmr.msra.gmra.mxu1 %v1792_v38 }
 0x65e   :  { %v1893_v39 = vpop.f32.mrf.mxu1 }
 0x65f   :  { %v1894_v0 = vadd.f32 %v1893_v39, %v3043_v13 }
 0x660   :  { %v2517_v40 = vpop.f32.mrf.mxu1 }
 0x661   :  { %1901 = vst.msk [vmem:[#allocation10 + $0x10] sm:$0xff] %vm989_vm1, %v1894_v0 }
 0x662   :  { %v1896_v41 = vpop.f32.mrf.mxu1 }
 0x663   :  { %v1897_v60 = vadd.f32 %v1896_v41, %v3043_v13 }
 0x664   :  { %v2518_v42 = vpop.f32.mrf.mxu1 }
 0x665   :  { %1902 = vst.msk [vmem:[#allocation10 + $0x18] sm:$0xff] %vm989_vm1, %v1897_v60 }
 0x666   :  { %2728 = shalt.err (!%p2725_p5)
}
 0x667   :  { %1914 = dma.vmem_to_hbm [thread:$0]  %s1909_s24, 512, %s3154_s9, [#allocation6], %s2747_s19, %s2747_s19, %s2748_s20  }
 0x668   :  { %2741 = dma.done.wait [#allocation6], 512  }
 0x669   :  { %2742 = vsyncadd [#allocation6], 4294966784 }
 0x66a   :  { %1918 = vsyncpa [#allocation5], 1 }
 0x66b   :  { %1919 = vsyncpa [#allocation8], 1 }
 0x66c   :  { %1920 = vsyncpa [#allocation6], 1 }

</bundles_post_ra>
